<compile_context>
chip_gen: v5e
topology: v5e:2x2
jax: 0.10.0
libtpu: 0.0.40
codegen_flags: <defaults>
</compile_context>

<pallas_src>
import numpy as np
import jax
import jax.numpy as jnp
from jax.experimental import pallas as pl
from jax.experimental.pallas import tpu as pltpu

N_CLASSES = 5
FEAT = 192              # fet_dim == sigLen (needed for the residual add)
D_MODEL = 4 * 17        # kerSize == 3 branch
OUT_PAD = 128           # lane-dense output width (logits live in columns 0..4)
EPS = 1e-5

# Lane on which pool2 feature j (j = 0..16) lives inside the kernel:
# pool1 row i sits on lane 2i, pool2 pairs pool1 rows {2j-1, 2j}.
POOL2_LANES = tuple([0] + [4 * j - 2 for j in range(1, 17)])


def convmlp_kernel(xres_ref,
                   cm_ref,                              # (6,192,64) conv1+BN as matmuls
                   c1_ref, w2_ref, c2_ref,              # SMEM: folded conv/BN constants
                   s1_ref, s2_ref,                      # 0/1 shift-by-1 / shift-by-2 matrices
                   wr_ref,                              # (4,64,96): (wlin_sp @ wf0), sparse rows
                   wf0_ref, bf0_ref,                    # (192,96), (1,96)  [bf0 += blin@wf0]
                   wf1_ref, bf1_ref,                    # (96,48),  (1,48)
                   wf2_ref, bf2_ref,                    # (48,128), (1,128) lane-dense padded
                   out_ref):
    x = xres_ref[...]                                    # (n, 192)
    s1 = s1_ref[...]                                     # y = a @ s1 -> y[l] = a[l+1]
    s2 = s2_ref[...]                                     # y = r @ s2 -> y[l] = r[l+2]
    lane0 = jax.lax.broadcasted_iota(jnp.int32, (1, 64), 1) == 0

    # ---- convlayer1: Conv2d(1,3,k=3,pad=1)+BN(folded)+ReLU+MaxPool(2,2) ----
    # Only output columns 0,1 survive the 2x2 pool; each (channel, column) is a
    # single MXU matmul from the raw 192-wide signal (weights built on host).
    pool1 = []
    for c in range(3):
        a0 = jnp.dot(x, cm_ref[2 * c + 0], preferred_element_type=jnp.float32)
        a1 = jnp.dot(x, cm_ref[2 * c + 1], preferred_element_type=jnp.float32)
        a = jnp.maximum(jnp.maximum(a0, a1) + c1_ref[c], 0.0)          # (n, 64)
        # MaxPool over H pairs {2i, 2i+1}: pool row i ends up on lane 2i.
        # The "+1 lane" operand is an exact permutation matmul (MXU is idle);
        # past-the-end lanes become 0, harmless since a >= 0 and odd lanes unused.
        a_next = jnp.dot(a, s1, preferred_element_type=jnp.float32)
        pool1.append(jnp.maximum(a, a_next))

    # ---- residual + linear_res + MLP layer 0, fused ----
    # y0_pre = xres@wf0 + sum_c f_c @ (wlin_c@wf0) + (bf0 + blin@wf0)
    y = jnp.dot(x, wf0_ref[...], preferred_element_type=jnp.float32) + bf0_ref[...]

    # ---- convlayer2: Conv2d(3,4,k=1,pad=1)+BN(folded)+ReLU+MaxPool(2) ----
    # The 1x1 conv with padding=1 only produces relu(bias) at the padded border;
    # fold that constant into the pooled max instead of materializing the pad.
    for co in range(4):
        border = jnp.maximum(c2_ref[co], 0.0)            # relu(bias) at padded positions
        r = (w2_ref[co * 3 + 0] * pool1[0] + w2_ref[co * 3 + 1] * pool1[1]
             + w2_ref[co * 3 + 2] * pool1[2] + c2_ref[co])
        r = jnp.maximum(r, border)                       # == max(relu(r), relu(border))
        # pool2[j] pairs pool1 rows {2j-1,2j} -> lanes {4j-2,4j}; result on lane 4j-2.
        r_next = jnp.dot(r, s2, preferred_element_type=jnp.float32)
        q = jnp.maximum(r, r_next)
        f = jnp.where(lane0, r, q)                       # j = 0 pools a single row (lane 0)
        # linear_res (with 64->17 compaction in zero-padded rows) pre-multiplied
        # by wf0 on the host: K=64 MXU matmul straight into the MLP accumulator.
        y = y + jnp.dot(f, wr_ref[co], preferred_element_type=jnp.float32)

    # dropout: eval mode -> identity.  TODO(synk): training-mode dropout not implemented.
    # ---- MLPReadout: 192 -> 96 -> 48 -> n_classes (output padded to 128 lanes) ----
    y = jnp.maximum(y, 0.0)
    y = jnp.maximum(jnp.dot(y, wf1_ref[...], preferred_element_type=jnp.float32)
                    + bf1_ref[...], 0.0)
    out_ref[...] = (jnp.dot(y, wf2_ref[...], preferred_element_type=jnp.float32)
                    + bf2_ref[...])


def _round_up(v, m):
    return ((v + m - 1) // m) * m


def _pick_tile(n_rows):
    """Per-generation row tile: v7x has 64 MiB VMEM (vs 128 MiB on v5e/v6e)."""
    try:
        kind = jax.devices()[0].device_kind.lower()
    except Exception:  # pragma: no cover - defensive
        kind = ""
    tile = 1024 if ("v7" in kind or "7x" in kind) else 2048
    return min(tile, _round_up(max(n_rows, 8), 8))


def convmlp_forward(x, fp, *, tile=None):
    L, W, Z = x.shape
    assert Z == FEAT, "ConvMLPNet hard-codes sigLen = 64*3 = 192"
    N = L * W
    x = x.astype(jnp.float32).reshape(N, FEAT)

    if tile is None:
        tile = _pick_tile(N)
    tile = _round_up(min(tile, _round_up(max(N, 8), 8)), 8)
    n_pad = _round_up(N, tile)
    xres = jnp.pad(x, ((0, n_pad - N), (0, 0)))          # (n_pad, 192) — the ONLY pipelined input

    # Exact 0/1 "bring value from lane l+1 / l+2" matrices (out-of-range -> 0).
    s1 = jnp.eye(64, k=-1, dtype=jnp.float32)
    s2 = jnp.eye(64, k=-2, dtype=jnp.float32)

    grid = (n_pad // tile,)
    smem = pl.BlockSpec(memory_space=pltpu.MemorySpace.SMEM)

    def _resident(shape):
        zeros = (0,) * len(shape)
        return pl.BlockSpec(shape, lambda i, _z=zeros: _z)

    out = pl.pallas_call(
        convmlp_kernel,
        out_shape=jax.ShapeDtypeStruct((n_pad, OUT_PAD), jnp.float32),
        grid=grid,
        in_specs=[
            pl.BlockSpec((tile, FEAT), lambda i: (i, 0)),       # xres (pipelined)
            _resident((6, FEAT, 64)),                           # conv1 matmul matrices
            smem, smem, smem,                                   # c1, w2f, c2
            _resident((64, 64)),                                # s1
            _resident((64, 64)),                                # s2
            _resident((4, 64, FEAT // 2)),                      # wr = wlin_sp @ wf0
            _resident((FEAT, FEAT // 2)),                       # wf0
            _resident((1, FEAT // 2)),                          # bf0 (+ blin@wf0)
            _resident((FEAT // 2, FEAT // 4)),                  # wf1
            _resident((1, FEAT // 4)),                          # bf1
            _resident((FEAT // 4, OUT_PAD)),                    # wf2 (padded to 128)
            _resident((1, OUT_PAD)),                            # bf2 (padded to 128)
        ],
        out_specs=pl.BlockSpec((tile, OUT_PAD), lambda i: (i, 0)),
        compiler_params=pltpu.CompilerParams(
            dimension_semantics=("parallel",),
            vmem_limit_bytes=40 * 1024 * 1024,
        ),
    )(xres, fp['cm'], fp['c1'], fp['w2f'], fp['c2'], s1, s2,
      fp['wr'], fp['wf0'], fp['bf0f'], fp['wf1'], fp['bf1'], fp['wf2p'], fp['bf2p'])

    return out[:N, :N_CLASSES].reshape(L, W, N_CLASSES)


def init_params(key):
    ks = jax.random.split(key, 20)
    p = {}
    # convlayer1: Conv2d(1,3,3,pad=1) + BatchNorm2d(3) (eval stats)
    p['w1'] = 0.3 * jax.random.normal(ks[0], (3, 1, 3, 3), jnp.float32)
    p['b1'] = 0.1 * jax.random.normal(ks[1], (3,), jnp.float32)
    p['g1'] = 1.0 + 0.1 * jax.random.normal(ks[2], (3,), jnp.float32)
    p['be1'] = 0.1 * jax.random.normal(ks[3], (3,), jnp.float32)
    p['mu1'] = 0.1 * jax.random.normal(ks[4], (3,), jnp.float32)
    p['var1'] = 1.0 + 0.5 * jax.random.uniform(ks[5], (3,), jnp.float32)
    # convlayer2: Conv2d(3,4,1,pad=1) + BatchNorm2d(4)
    p['w2'] = 0.3 * jax.random.normal(ks[6], (4, 3), jnp.float32)
    p['b2'] = 0.1 * jax.random.normal(ks[7], (4,), jnp.float32)
    p['g2'] = 1.0 + 0.1 * jax.random.normal(ks[8], (4,), jnp.float32)
    p['be2'] = 0.1 * jax.random.normal(ks[9], (4,), jnp.float32)
    p['mu2'] = 0.1 * jax.random.normal(ks[10], (4,), jnp.float32)
    p['var2'] = 1.0 + 0.5 * jax.random.uniform(ks[11], (4,), jnp.float32)
    # linear_res: d_model(68) -> fet_dim(192)
    p['wlin'] = jax.random.normal(ks[12], (D_MODEL, FEAT), jnp.float32) / jnp.sqrt(D_MODEL)
    p['blin'] = 0.05 * jax.random.normal(ks[13], (FEAT,), jnp.float32)
    # MLPReadout (L=2): 192 -> 96 -> 48 -> n_classes
    p['wf0'] = jax.random.normal(ks[14], (FEAT, FEAT // 2), jnp.float32) / jnp.sqrt(FEAT)
    p['bf0'] = 0.05 * jax.random.normal(ks[15], (FEAT // 2,), jnp.float32)
    p['wf1'] = jax.random.normal(ks[16], (FEAT // 2, FEAT // 4), jnp.float32) / jnp.sqrt(FEAT // 2)
    p['bf1'] = 0.05 * jax.random.normal(ks[17], (FEAT // 4,), jnp.float32)
    p['wf2'] = jax.random.normal(ks[18], (FEAT // 4, N_CLASSES), jnp.float32) / jnp.sqrt(FEAT // 4)
    p['bf2'] = 0.05 * jax.random.normal(ks[19], (N_CLASSES,), jnp.float32)
    return p


def fold_params(p):
    """Fold eval-mode BatchNorm into the conv weights/biases, express conv1 as
    six (192->64) matmul matrices, and pre-fuse linear_res/blin into the first
    MLP layer.  All re-layouts are done on the host, once."""
    pn = {k: np.asarray(v) for k, v in p.items()}
    s1v = pn['g1'] / np.sqrt(pn['var1'] + EPS)
    s2v = pn['g2'] / np.sqrt(pn['var2'] + EPS)

    w1f = pn['w1'][:, 0] * s1v[:, None, None]                  # (3,3,3), BN-folded
    c1 = pn['b1'] * s1v + pn['be1'] - pn['mu1'] * s1v
    w2f = (pn['w2'] * s2v[:, None]).reshape(12)
    c2 = pn['b2'] * s2v + pn['be2'] - pn['mu2'] * s2v

    # conv1 (+ zero padding) as matmul matrices: out(c, w_out)[n, h] =
    #   sum_{kh,kw} w1f[c,kh,kw] * xres[n, 3*(h+kh-1) + (w_out+kw-1)]  (OOB -> 0)
    cm = np.zeros((3, 2, FEAT, 64), np.float32)
    h = np.arange(64)
    for c in range(3):
        for w_out in range(2):
            for kh in range(3):
                hh = h + kh - 1
                m = (hh >= 0) & (hh < 64)
                for kw in range(3):
                    cc = w_out + kw - 1
                    if not (0 <= cc < 3):
                        continue
                    cm[c, w_out, 3 * hh[m] + cc, h[m]] += w1f[c, kh, kw]
    cm = cm.reshape(6, FEAT, 64)

    # linear_res rows re-laid-out onto the 17 lanes where pool2 feature j of
    # channel co lives inside the kernel, then pre-multiplied by wf0 (fusion of
    # linear_res + residual-add + MLP layer 0).
    wlin_sp = np.zeros((4, 64, FEAT), np.float32)
    wlin_sp[:, np.asarray(POOL2_LANES), :] = pn['wlin'].reshape(4, 17, FEAT)
    wr = np.einsum('cki,io->cko', wlin_sp, pn['wf0']).astype(np.float32)   # (4,64,96)
    bf0f = (pn['bf0'] + pn['blin'] @ pn['wf0']).reshape(1, -1).astype(np.float32)

    wf2p = np.zeros((FEAT // 4, OUT_PAD), np.float32)
    wf2p[:, :N_CLASSES] = pn['wf2']
    bf2p = np.zeros((1, OUT_PAD), np.float32)
    bf2p[0, :N_CLASSES] = pn['bf2']

    return {
        'cm': jnp.asarray(cm),
        'c1': jnp.asarray(c1.astype(np.float32)),
        'w2f': jnp.asarray(w2f.astype(np.float32)),
        'c2': jnp.asarray(c2.astype(np.float32)),
        'wr': jnp.asarray(wr),
        'wf0': jnp.asarray(pn['wf0']),
        'bf0f': jnp.asarray(bf0f),
        'wf1': jnp.asarray(pn['wf1']),
        'bf1': jnp.asarray(pn['bf1'].reshape(1, -1)),
        'wf2p': jnp.asarray(wf2p),
        'bf2p': jnp.asarray(bf2p),
    }


def reference_forward(x, p):
    """Pure-JAX (NCHW) mirror of the PyTorch forward, for validation."""
    L, W, Z = x.shape
    N = L * W
    x = x.astype(jnp.float32)
    h = x.reshape(N, 1, 64, 3)
    hp = jnp.pad(h, ((0, 0), (0, 0), (1, 1), (1, 1)))
    c1 = jnp.zeros((N, 3, 64, 3), jnp.float32)
    for kh in range(3):
        for kw in range(3):
            c1 = c1 + jnp.einsum('nihw,oi->nohw', hp[:, :, kh:kh + 64, kw:kw + 3],
                                 p['w1'][:, :, kh, kw], precision='highest')
    c1 = c1 + p['b1'][None, :, None, None]
    c1 = (c1 - p['mu1'][None, :, None, None]) / jnp.sqrt(p['var1'] + EPS)[None, :, None, None] \
         * p['g1'][None, :, None, None] + p['be1'][None, :, None, None]
    c1 = jnp.maximum(c1, 0.0)
    pool1 = c1[:, :, :, :2].reshape(N, 3, 32, 2, 2).max(axis=(3, 4))[..., None]   # (N,3,32,1)
    hp2 = jnp.pad(pool1, ((0, 0), (0, 0), (1, 1), (1, 1)))                        # (N,3,34,3)
    c2 = jnp.einsum('nihw,oi->nohw', hp2, p['w2'], precision='highest') \
         + p['b2'][None, :, None, None]
    c2 = (c2 - p['mu2'][None, :, None, None]) / jnp.sqrt(p['var2'] + EPS)[None, :, None, None] \
         * p['g2'][None, :, None, None] + p['be2'][None, :, None, None]
    c2 = jnp.maximum(c2, 0.0)
    pool2 = c2[:, :, :, :2].reshape(N, 4, 17, 2, 2).max(axis=(3, 4))              # (N,4,17)
    feat = pool2.reshape(L, W, D_MODEL)
    hlin = jnp.dot(feat, p['wlin'], precision='highest') + p['blin']
    hres = x + hlin                                                               # residual
    y = jnp.maximum(jnp.dot(hres, p['wf0'], precision='highest') + p['bf0'], 0.0)
    y = jnp.maximum(jnp.dot(y, p['wf1'], precision='highest') + p['bf1'], 0.0)
    y = jnp.dot(y, p['wf2'], precision='highest') + p['bf2']
    return y


if __name__ == "__main__":
    key = jax.random.PRNGKey(0)
    k_x, k_x2, k_p = jax.random.split(key, 3)

    params = init_params(k_p)
    kparams = fold_params(params)

    # Small single-tile case (Z = 192 is fixed by the module).
    L, W = 2, 4
    x = jax.random.normal(k_x, (L, W, 192), jnp.float32)
    out = jax.block_until_ready(convmlp_forward(x, kparams))
    assert out.shape == (L, W, N_CLASSES)
    ref = reference_forward(x, params)
    if not jnp.allclose(out, ref, rtol=2e-3, atol=2e-3):
        raise AssertionError("Pallas kernel does not match pure-JAX reference (single tile)")

    # Multi-tile case: exercises the batch grid / double-buffered pipeline.
    L2, W2 = 8, 40
    x2 = jax.random.normal(k_x2, (L2, W2, 192), jnp.float32)
    out2 = jax.block_until_ready(convmlp_forward(x2, kparams, tile=64))
    assert out2.shape == (L2, W2, N_CLASSES)
    ref2 = reference_forward(x2, params)
    if not jnp.allclose(out2, ref2, rtol=2e-3, atol=2e-3):
        raise AssertionError("Pallas kernel does not match pure-JAX reference (multi tile)")

    print("KERNEL_OK")
</pallas_src>

<mosaic_0001>
module attributes {stable_mosaic.version = 11 : i64} {
  func.func @convmlp_kernel(%arg0: i32, %arg1: memref<8x192xf32, #tpu.memory_space<vmem>>, %arg2: memref<6x192x64xf32, #tpu.memory_space<vmem>>, %arg3: memref<3xf32, #tpu.memory_space<smem>>, %arg4: memref<12xf32, #tpu.memory_space<smem>>, %arg5: memref<4xf32, #tpu.memory_space<smem>>, %arg6: memref<64x64xf32, #tpu.memory_space<vmem>>, %arg7: memref<64x64xf32, #tpu.memory_space<vmem>>, %arg8: memref<4x64x96xf32, #tpu.memory_space<vmem>>, %arg9: memref<192x96xf32, #tpu.memory_space<vmem>>, %arg10: memref<1x96xf32, #tpu.memory_space<vmem>>, %arg11: memref<96x48xf32, #tpu.memory_space<vmem>>, %arg12: memref<1x48xf32, #tpu.memory_space<vmem>>, %arg13: memref<48x128xf32, #tpu.memory_space<vmem>>, %arg14: memref<1x128xf32, #tpu.memory_space<vmem>>, %arg15: memref<8x128xf32, #tpu.memory_space<vmem>>) attributes {dimension_semantics = [#tpu.dimension_semantics<parallel>], iteration_bounds = array<i64: 1>, scalar_prefetch = 0 : i64, scratch_operands = 0 : i64, tpu.core_type = #tpu.core_type<tc>, window_params = [{transform_indices = @transform_0, window_bounds = array<i64: 8, 192>}, {pipeline_mode = #tpu.pipeline_mode<synchronous>, transform_indices = @transform_1, window_bounds = array<i64: 6, 192, 64>}, {transform_indices = @transform_2, window_bounds = array<i64: 3>}, {transform_indices = @transform_3, window_bounds = array<i64: 12>}, {transform_indices = @transform_4, window_bounds = array<i64: 4>}, {pipeline_mode = #tpu.pipeline_mode<synchronous>, transform_indices = @transform_5, window_bounds = array<i64: 64, 64>}, {pipeline_mode = #tpu.pipeline_mode<synchronous>, transform_indices = @transform_6, window_bounds = array<i64: 64, 64>}, {pipeline_mode = #tpu.pipeline_mode<synchronous>, transform_indices = @transform_7, window_bounds = array<i64: 4, 64, 96>}, {pipeline_mode = #tpu.pipeline_mode<synchronous>, transform_indices = @transform_8, window_bounds = array<i64: 192, 96>}, {pipeline_mode = #tpu.pipeline_mode<synchronous>, transform_indices = @transform_9, window_bounds = array<i64: 1, 96>}, {pipeline_mode = #tpu.pipeline_mode<synchronous>, transform_indices = @transform_10, window_bounds = array<i64: 96, 48>}, {pipeline_mode = #tpu.pipeline_mode<synchronous>, transform_indices = @transform_11, window_bounds = array<i64: 1, 48>}, {pipeline_mode = #tpu.pipeline_mode<synchronous>, transform_indices = @transform_12, window_bounds = array<i64: 48, 128>}, {pipeline_mode = #tpu.pipeline_mode<synchronous>, transform_indices = @transform_13, window_bounds = array<i64: 1, 128>}, {transform_indices = @transform_14, window_bounds = array<i64: 8, 128>}]} {
    %c0 = arith.constant 0 : index
    %c0_0 = arith.constant 0 : index
    %0 = vector.load %arg1[%c0, %c0_0] : memref<8x192xf32, #tpu.memory_space<vmem>>, vector<8x192xf32>
    %c0_1 = arith.constant 0 : index
    %c0_2 = arith.constant 0 : index
    %1 = vector.load %arg6[%c0_1, %c0_2] : memref<64x64xf32, #tpu.memory_space<vmem>>, vector<64x64xf32>
    %c0_3 = arith.constant 0 : index
    %c0_4 = arith.constant 0 : index
    %2 = vector.load %arg7[%c0_3, %c0_4] : memref<64x64xf32, #tpu.memory_space<vmem>>, vector<64x64xf32>
    %3 = tpu.iota {dimensions = array<i32: 1>} : vector<1x64xi32>
    %c0_i32 = arith.constant 0 : i32
    %4 = vector.broadcast %c0_i32 : i32 to vector<1x64xi32>
    %5 = arith.cmpi eq, %3, %4 : vector<1x64xi32>
    %c0_5 = arith.constant 0 : index
    %c0_6 = arith.constant 0 : index
    %c0_7 = arith.constant 0 : index
    %6 = vector.load %arg2[%c0_5, %c0_6, %c0_7] : memref<6x192x64xf32, #tpu.memory_space<vmem>>, vector<1x192x64xf32>
    %7 = vector.shape_cast %6 : vector<1x192x64xf32> to vector<192x64xf32>
    %cst = arith.constant dense<0.000000e+00> : vector<8x64xf32>
    %8 = tpu.matmul %0, %7, %cst {dimension_numbers = #tpu.dot_dimension_numbers<[1], [0], [0], [1], [0, 0, 1, 1], [], []>} : vector<8x192xf32>, vector<192x64xf32>, vector<8x64xf32> -> vector<8x64xf32>
    %c1 = arith.constant 1 : index
    %c0_8 = arith.constant 0 : index
    %c0_9 = arith.constant 0 : index
    %9 = vector.load %arg2[%c1, %c0_8, %c0_9] : memref<6x192x64xf32, #tpu.memory_space<vmem>>, vector<1x192x64xf32>
    %10 = vector.shape_cast %9 : vector<1x192x64xf32> to vector<192x64xf32>
    %cst_10 = arith.constant dense<0.000000e+00> : vector<8x64xf32>
    %11 = tpu.matmul %0, %10, %cst_10 {dimension_numbers = #tpu.dot_dimension_numbers<[1], [0], [0], [1], [0, 0, 1, 1], [], []>} : vector<8x192xf32>, vector<192x64xf32>, vector<8x64xf32> -> vector<8x64xf32>
    %12 = arith.maximumf %8, %11 : vector<8x64xf32>
    %c0_11 = arith.constant 0 : index
    %13 = memref.load %arg3[%c0_11] : memref<3xf32, #tpu.memory_space<smem>>
    %14 = vector.broadcast %13 : f32 to vector<8x64xf32>
    %15 = arith.addf %12, %14 : vector<8x64xf32>
    %cst_12 = arith.constant 0.000000e+00 : f32
    %16 = vector.broadcast %cst_12 : f32 to vector<8x64xf32>
    %17 = arith.maximumf %15, %16 : vector<8x64xf32>
    %cst_13 = arith.constant dense<0.000000e+00> : vector<8x64xf32>
    %18 = tpu.matmul %17, %1, %cst_13 {dimension_numbers = #tpu.dot_dimension_numbers<[1], [0], [0], [1], [0, 0, 1, 1], [], []>} : vector<8x64xf32>, vector<64x64xf32>, vector<8x64xf32> -> vector<8x64xf32>
    %19 = arith.maximumf %17, %18 : vector<8x64xf32>
    %c2 = arith.constant 2 : index
    %c0_14 = arith.constant 0 : index
    %c0_15 = arith.constant 0 : index
    %20 = vector.load %arg2[%c2, %c0_14, %c0_15] : memref<6x192x64xf32, #tpu.memory_space<vmem>>, vector<1x192x64xf32>
    %21 = vector.shape_cast %20 : vector<1x192x64xf32> to vector<192x64xf32>
    %cst_16 = arith.constant dense<0.000000e+00> : vector<8x64xf32>
    %22 = tpu.matmul %0, %21, %cst_16 {dimension_numbers = #tpu.dot_dimension_numbers<[1], [0], [0], [1], [0, 0, 1, 1], [], []>} : vector<8x192xf32>, vector<192x64xf32>, vector<8x64xf32> -> vector<8x64xf32>
    %c3 = arith.constant 3 : index
    %c0_17 = arith.constant 0 : index
    %c0_18 = arith.constant 0 : index
    %23 = vector.load %arg2[%c3, %c0_17, %c0_18] : memref<6x192x64xf32, #tpu.memory_space<vmem>>, vector<1x192x64xf32>
    %24 = vector.shape_cast %23 : vector<1x192x64xf32> to vector<192x64xf32>
    %cst_19 = arith.constant dense<0.000000e+00> : vector<8x64xf32>
    %25 = tpu.matmul %0, %24, %cst_19 {dimension_numbers = #tpu.dot_dimension_numbers<[1], [0], [0], [1], [0, 0, 1, 1], [], []>} : vector<8x192xf32>, vector<192x64xf32>, vector<8x64xf32> -> vector<8x64xf32>
    %26 = arith.maximumf %22, %25 : vector<8x64xf32>
    %c1_20 = arith.constant 1 : index
    %27 = memref.load %arg3[%c1_20] : memref<3xf32, #tpu.memory_space<smem>>
    %28 = vector.broadcast %27 : f32 to vector<8x64xf32>
    %29 = arith.addf %26, %28 : vector<8x64xf32>
    %cst_21 = arith.constant 0.000000e+00 : f32
    %30 = vector.broadcast %cst_21 : f32 to vector<8x64xf32>
    %31 = arith.maximumf %29, %30 : vector<8x64xf32>
    %cst_22 = arith.constant dense<0.000000e+00> : vector<8x64xf32>
    %32 = tpu.matmul %31, %1, %cst_22 {dimension_numbers = #tpu.dot_dimension_numbers<[1], [0], [0], [1], [0, 0, 1, 1], [], []>} : vector<8x64xf32>, vector<64x64xf32>, vector<8x64xf32> -> vector<8x64xf32>
    %33 = arith.maximumf %31, %32 : vector<8x64xf32>
    %c4 = arith.constant 4 : index
    %c0_23 = arith.constant 0 : index
    %c0_24 = arith.constant 0 : index
    %34 = vector.load %arg2[%c4, %c0_23, %c0_24] : memref<6x192x64xf32, #tpu.memory_space<vmem>>, vector<1x192x64xf32>
    %35 = vector.shape_cast %34 : vector<1x192x64xf32> to vector<192x64xf32>
    %cst_25 = arith.constant dense<0.000000e+00> : vector<8x64xf32>
    %36 = tpu.matmul %0, %35, %cst_25 {dimension_numbers = #tpu.dot_dimension_numbers<[1], [0], [0], [1], [0, 0, 1, 1], [], []>} : vector<8x192xf32>, vector<192x64xf32>, vector<8x64xf32> -> vector<8x64xf32>
    %c5 = arith.constant 5 : index
    %c0_26 = arith.constant 0 : index
    %c0_27 = arith.constant 0 : index
    %37 = vector.load %arg2[%c5, %c0_26, %c0_27] : memref<6x192x64xf32, #tpu.memory_space<vmem>>, vector<1x192x64xf32>
    %38 = vector.shape_cast %37 : vector<1x192x64xf32> to vector<192x64xf32>
    %cst_28 = arith.constant dense<0.000000e+00> : vector<8x64xf32>
    %39 = tpu.matmul %0, %38, %cst_28 {dimension_numbers = #tpu.dot_dimension_numbers<[1], [0], [0], [1], [0, 0, 1, 1], [], []>} : vector<8x192xf32>, vector<192x64xf32>, vector<8x64xf32> -> vector<8x64xf32>
    %40 = arith.maximumf %36, %39 : vector<8x64xf32>
    %c2_29 = arith.constant 2 : index
    %41 = memref.load %arg3[%c2_29] : memref<3xf32, #tpu.memory_space<smem>>
    %42 = vector.broadcast %41 : f32 to vector<8x64xf32>
    %43 = arith.addf %40, %42 : vector<8x64xf32>
    %cst_30 = arith.constant 0.000000e+00 : f32
    %44 = vector.broadcast %cst_30 : f32 to vector<8x64xf32>
    %45 = arith.maximumf %43, %44 : vector<8x64xf32>
    %cst_31 = arith.constant dense<0.000000e+00> : vector<8x64xf32>
    %46 = tpu.matmul %45, %1, %cst_31 {dimension_numbers = #tpu.dot_dimension_numbers<[1], [0], [0], [1], [0, 0, 1, 1], [], []>} : vector<8x64xf32>, vector<64x64xf32>, vector<8x64xf32> -> vector<8x64xf32>
    %47 = arith.maximumf %45, %46 : vector<8x64xf32>
    %c0_32 = arith.constant 0 : index
    %c0_33 = arith.constant 0 : index
    %48 = vector.load %arg9[%c0_32, %c0_33] : memref<192x96xf32, #tpu.memory_space<vmem>>, vector<192x96xf32>
    %cst_34 = arith.constant dense<0.000000e+00> : vector<8x96xf32>
    %49 = tpu.matmul %0, %48, %cst_34 {dimension_numbers = #tpu.dot_dimension_numbers<[1], [0], [0], [1], [0, 0, 1, 1], [], []>} : vector<8x192xf32>, vector<192x96xf32>, vector<8x96xf32> -> vector<8x96xf32>
    %c0_35 = arith.constant 0 : index
    %c0_36 = arith.constant 0 : index
    %50 = vector.load %arg10[%c0_35, %c0_36] : memref<1x96xf32, #tpu.memory_space<vmem>>, vector<1x96xf32>
    %51 = vector.broadcast %50 : vector<1x96xf32> to vector<8x96xf32>
    %52 = arith.addf %49, %51 : vector<8x96xf32>
    %c0_37 = arith.constant 0 : index
    %53 = memref.load %arg5[%c0_37] : memref<4xf32, #tpu.memory_space<smem>>
    %cst_38 = arith.constant 0.000000e+00 : f32
    %54 = arith.maximumf %53, %cst_38 : f32
    %c0_39 = arith.constant 0 : index
    %55 = memref.load %arg4[%c0_39] : memref<12xf32, #tpu.memory_space<smem>>
    %56 = vector.broadcast %55 : f32 to vector<8x64xf32>
    %57 = arith.mulf %56, %19 : vector<8x64xf32>
    %c1_40 = arith.constant 1 : index
    %58 = memref.load %arg4[%c1_40] : memref<12xf32, #tpu.memory_space<smem>>
    %59 = vector.broadcast %58 : f32 to vector<8x64xf32>
    %60 = arith.mulf %59, %33 : vector<8x64xf32>
    %61 = arith.addf %57, %60 : vector<8x64xf32>
    %c2_41 = arith.constant 2 : index
    %62 = memref.load %arg4[%c2_41] : memref<12xf32, #tpu.memory_space<smem>>
    %63 = vector.broadcast %62 : f32 to vector<8x64xf32>
    %64 = arith.mulf %63, %47 : vector<8x64xf32>
    %65 = arith.addf %61, %64 : vector<8x64xf32>
    %c0_42 = arith.constant 0 : index
    %66 = memref.load %arg5[%c0_42] : memref<4xf32, #tpu.memory_space<smem>>
    %67 = vector.broadcast %66 : f32 to vector<8x64xf32>
    %68 = arith.addf %65, %67 : vector<8x64xf32>
    %69 = vector.broadcast %54 : f32 to vector<8x64xf32>
    %70 = arith.maximumf %68, %69 : vector<8x64xf32>
    %cst_43 = arith.constant dense<0.000000e+00> : vector<8x64xf32>
    %71 = tpu.matmul %70, %2, %cst_43 {dimension_numbers = #tpu.dot_dimension_numbers<[1], [0], [0], [1], [0, 0, 1, 1], [], []>} : vector<8x64xf32>, vector<64x64xf32>, vector<8x64xf32> -> vector<8x64xf32>
    %72 = arith.maximumf %70, %71 : vector<8x64xf32>
    %73 = vector.shape_cast %5 : vector<1x64xi1> to vector<1x64xi1>
    %74 = vector.broadcast %73 : vector<1x64xi1> to vector<8x64xi1>
    %75 = arith.select %74, %70, %72 : vector<8x64xi1>, vector<8x64xf32>
    %c0_44 = arith.constant 0 : index
    %c0_45 = arith.constant 0 : index
    %c0_46 = arith.constant 0 : index
    %76 = vector.load %arg8[%c0_44, %c0_45, %c0_46] : memref<4x64x96xf32, #tpu.memory_space<vmem>>, vector<1x64x96xf32>
    %77 = vector.shape_cast %76 : vector<1x64x96xf32> to vector<64x96xf32>
    %cst_47 = arith.constant dense<0.000000e+00> : vector<8x96xf32>
    %78 = tpu.matmul %75, %77, %cst_47 {dimension_numbers = #tpu.dot_dimension_numbers<[1], [0], [0], [1], [0, 0, 1, 1], [], []>} : vector<8x64xf32>, vector<64x96xf32>, vector<8x96xf32> -> vector<8x96xf32>
    %79 = arith.addf %52, %78 : vector<8x96xf32>
    %c1_48 = arith.constant 1 : index
    %80 = memref.load %arg5[%c1_48] : memref<4xf32, #tpu.memory_space<smem>>
    %cst_49 = arith.constant 0.000000e+00 : f32
    %81 = arith.maximumf %80, %cst_49 : f32
    %c3_50 = arith.constant 3 : index
    %82 = memref.load %arg4[%c3_50] : memref<12xf32, #tpu.memory_space<smem>>
    %83 = vector.broadcast %82 : f32 to vector<8x64xf32>
    %84 = arith.mulf %83, %19 : vector<8x64xf32>
    %c4_51 = arith.constant 4 : index
    %85 = memref.load %arg4[%c4_51] : memref<12xf32, #tpu.memory_space<smem>>
    %86 = vector.broadcast %85 : f32 to vector<8x64xf32>
    %87 = arith.mulf %86, %33 : vector<8x64xf32>
    %88 = arith.addf %84, %87 : vector<8x64xf32>
    %c5_52 = arith.constant 5 : index
    %89 = memref.load %arg4[%c5_52] : memref<12xf32, #tpu.memory_space<smem>>
    %90 = vector.broadcast %89 : f32 to vector<8x64xf32>
    %91 = arith.mulf %90, %47 : vector<8x64xf32>
    %92 = arith.addf %88, %91 : vector<8x64xf32>
    %c1_53 = arith.constant 1 : index
    %93 = memref.load %arg5[%c1_53] : memref<4xf32, #tpu.memory_space<smem>>
    %94 = vector.broadcast %93 : f32 to vector<8x64xf32>
    %95 = arith.addf %92, %94 : vector<8x64xf32>
    %96 = vector.broadcast %81 : f32 to vector<8x64xf32>
    %97 = arith.maximumf %95, %96 : vector<8x64xf32>
    %cst_54 = arith.constant dense<0.000000e+00> : vector<8x64xf32>
    %98 = tpu.matmul %97, %2, %cst_54 {dimension_numbers = #tpu.dot_dimension_numbers<[1], [0], [0], [1], [0, 0, 1, 1], [], []>} : vector<8x64xf32>, vector<64x64xf32>, vector<8x64xf32> -> vector<8x64xf32>
    %99 = arith.maximumf %97, %98 : vector<8x64xf32>
    %100 = vector.shape_cast %5 : vector<1x64xi1> to vector<1x64xi1>
    %101 = vector.broadcast %100 : vector<1x64xi1> to vector<8x64xi1>
    %102 = arith.select %101, %97, %99 : vector<8x64xi1>, vector<8x64xf32>
    %c1_55 = arith.constant 1 : index
    %c0_56 = arith.constant 0 : index
    %c0_57 = arith.constant 0 : index
    %103 = vector.load %arg8[%c1_55, %c0_56, %c0_57] : memref<4x64x96xf32, #tpu.memory_space<vmem>>, vector<1x64x96xf32>
    %104 = vector.shape_cast %103 : vector<1x64x96xf32> to vector<64x96xf32>
    %cst_58 = arith.constant dense<0.000000e+00> : vector<8x96xf32>
    %105 = tpu.matmul %102, %104, %cst_58 {dimension_numbers = #tpu.dot_dimension_numbers<[1], [0], [0], [1], [0, 0, 1, 1], [], []>} : vector<8x64xf32>, vector<64x96xf32>, vector<8x96xf32> -> vector<8x96xf32>
    %106 = arith.addf %79, %105 : vector<8x96xf32>
    %c2_59 = arith.constant 2 : index
    %107 = memref.load %arg5[%c2_59] : memref<4xf32, #tpu.memory_space<smem>>
    %cst_60 = arith.constant 0.000000e+00 : f32
    %108 = arith.maximumf %107, %cst_60 : f32
    %c6 = arith.constant 6 : index
    %109 = memref.load %arg4[%c6] : memref<12xf32, #tpu.memory_space<smem>>
    %110 = vector.broadcast %109 : f32 to vector<8x64xf32>
    %111 = arith.mulf %110, %19 : vector<8x64xf32>
    %c7 = arith.constant 7 : index
    %112 = memref.load %arg4[%c7] : memref<12xf32, #tpu.memory_space<smem>>
    %113 = vector.broadcast %112 : f32 to vector<8x64xf32>
    %114 = arith.mulf %113, %33 : vector<8x64xf32>
    %115 = arith.addf %111, %114 : vector<8x64xf32>
    %c8 = arith.constant 8 : index
    %116 = memref.load %arg4[%c8] : memref<12xf32, #tpu.memory_space<smem>>
    %117 = vector.broadcast %116 : f32 to vector<8x64xf32>
    %118 = arith.mulf %117, %47 : vector<8x64xf32>
    %119 = arith.addf %115, %118 : vector<8x64xf32>
    %c2_61 = arith.constant 2 : index
    %120 = memref.load %arg5[%c2_61] : memref<4xf32, #tpu.memory_space<smem>>
    %121 = vector.broadcast %120 : f32 to vector<8x64xf32>
    %122 = arith.addf %119, %121 : vector<8x64xf32>
    %123 = vector.broadcast %108 : f32 to vector<8x64xf32>
    %124 = arith.maximumf %122, %123 : vector<8x64xf32>
    %cst_62 = arith.constant dense<0.000000e+00> : vector<8x64xf32>
    %125 = tpu.matmul %124, %2, %cst_62 {dimension_numbers = #tpu.dot_dimension_numbers<[1], [0], [0], [1], [0, 0, 1, 1], [], []>} : vector<8x64xf32>, vector<64x64xf32>, vector<8x64xf32> -> vector<8x64xf32>
    %126 = arith.maximumf %124, %125 : vector<8x64xf32>
    %127 = vector.shape_cast %5 : vector<1x64xi1> to vector<1x64xi1>
    %128 = vector.broadcast %127 : vector<1x64xi1> to vector<8x64xi1>
    %129 = arith.select %128, %124, %126 : vector<8x64xi1>, vector<8x64xf32>
    %c2_63 = arith.constant 2 : index
    %c0_64 = arith.constant 0 : index
    %c0_65 = arith.constant 0 : index
    %130 = vector.load %arg8[%c2_63, %c0_64, %c0_65] : memref<4x64x96xf32, #tpu.memory_space<vmem>>, vector<1x64x96xf32>
    %131 = vector.shape_cast %130 : vector<1x64x96xf32> to vector<64x96xf32>
    %cst_66 = arith.constant dense<0.000000e+00> : vector<8x96xf32>
    %132 = tpu.matmul %129, %131, %cst_66 {dimension_numbers = #tpu.dot_dimension_numbers<[1], [0], [0], [1], [0, 0, 1, 1], [], []>} : vector<8x64xf32>, vector<64x96xf32>, vector<8x96xf32> -> vector<8x96xf32>
    %133 = arith.addf %106, %132 : vector<8x96xf32>
    %c3_67 = arith.constant 3 : index
    %134 = memref.load %arg5[%c3_67] : memref<4xf32, #tpu.memory_space<smem>>
    %cst_68 = arith.constant 0.000000e+00 : f32
    %135 = arith.maximumf %134, %cst_68 : f32
    %c9 = arith.constant 9 : index
    %136 = memref.load %arg4[%c9] : memref<12xf32, #tpu.memory_space<smem>>
    %137 = vector.broadcast %136 : f32 to vector<8x64xf32>
    %138 = arith.mulf %137, %19 : vector<8x64xf32>
    %c10 = arith.constant 10 : index
    %139 = memref.load %arg4[%c10] : memref<12xf32, #tpu.memory_space<smem>>
    %140 = vector.broadcast %139 : f32 to vector<8x64xf32>
    %141 = arith.mulf %140, %33 : vector<8x64xf32>
    %142 = arith.addf %138, %141 : vector<8x64xf32>
    %c11 = arith.constant 11 : index
    %143 = memref.load %arg4[%c11] : memref<12xf32, #tpu.memory_space<smem>>
    %144 = vector.broadcast %143 : f32 to vector<8x64xf32>
    %145 = arith.mulf %144, %47 : vector<8x64xf32>
    %146 = arith.addf %142, %145 : vector<8x64xf32>
    %c3_69 = arith.constant 3 : index
    %147 = memref.load %arg5[%c3_69] : memref<4xf32, #tpu.memory_space<smem>>
    %148 = vector.broadcast %147 : f32 to vector<8x64xf32>
    %149 = arith.addf %146, %148 : vector<8x64xf32>
    %150 = vector.broadcast %135 : f32 to vector<8x64xf32>
    %151 = arith.maximumf %149, %150 : vector<8x64xf32>
    %cst_70 = arith.constant dense<0.000000e+00> : vector<8x64xf32>
    %152 = tpu.matmul %151, %2, %cst_70 {dimension_numbers = #tpu.dot_dimension_numbers<[1], [0], [0], [1], [0, 0, 1, 1], [], []>} : vector<8x64xf32>, vector<64x64xf32>, vector<8x64xf32> -> vector<8x64xf32>
    %153 = arith.maximumf %151, %152 : vector<8x64xf32>
    %154 = vector.shape_cast %5 : vector<1x64xi1> to vector<1x64xi1>
    %155 = vector.broadcast %154 : vector<1x64xi1> to vector<8x64xi1>
    %156 = arith.select %155, %151, %153 : vector<8x64xi1>, vector<8x64xf32>
    %c3_71 = arith.constant 3 : index
    %c0_72 = arith.constant 0 : index
    %c0_73 = arith.constant 0 : index
    %157 = vector.load %arg8[%c3_71, %c0_72, %c0_73] : memref<4x64x96xf32, #tpu.memory_space<vmem>>, vector<1x64x96xf32>
    %158 = vector.shape_cast %157 : vector<1x64x96xf32> to vector<64x96xf32>
    %cst_74 = arith.constant dense<0.000000e+00> : vector<8x96xf32>
    %159 = tpu.matmul %156, %158, %cst_74 {dimension_numbers = #tpu.dot_dimension_numbers<[1], [0], [0], [1], [0, 0, 1, 1], [], []>} : vector<8x64xf32>, vector<64x96xf32>, vector<8x96xf32> -> vector<8x96xf32>
    %160 = arith.addf %133, %159 : vector<8x96xf32>
    %cst_75 = arith.constant 0.000000e+00 : f32
    %161 = vector.broadcast %cst_75 : f32 to vector<8x96xf32>
    %162 = arith.maximumf %160, %161 : vector<8x96xf32>
    %c0_76 = arith.constant 0 : index
    %c0_77 = arith.constant 0 : index
    %163 = vector.load %arg11[%c0_76, %c0_77] : memref<96x48xf32, #tpu.memory_space<vmem>>, vector<96x48xf32>
    %cst_78 = arith.constant dense<0.000000e+00> : vector<8x48xf32>
    %164 = tpu.matmul %162, %163, %cst_78 {dimension_numbers = #tpu.dot_dimension_numbers<[1], [0], [0], [1], [0, 0, 1, 1], [], []>} : vector<8x96xf32>, vector<96x48xf32>, vector<8x48xf32> -> vector<8x48xf32>
    %c0_79 = arith.constant 0 : index
    %c0_80 = arith.constant 0 : index
    %165 = vector.load %arg12[%c0_79, %c0_80] : memref<1x48xf32, #tpu.memory_space<vmem>>, vector<1x48xf32>
    %166 = vector.broadcast %165 : vector<1x48xf32> to vector<8x48xf32>
    %167 = arith.addf %164, %166 : vector<8x48xf32>
    %cst_81 = arith.constant 0.000000e+00 : f32
    %168 = vector.broadcast %cst_81 : f32 to vector<8x48xf32>
    %169 = arith.maximumf %167, %168 : vector<8x48xf32>
    %c0_82 = arith.constant 0 : index
    %c0_83 = arith.constant 0 : index
    %170 = vector.load %arg13[%c0_82, %c0_83] : memref<48x128xf32, #tpu.memory_space<vmem>>, vector<48x128xf32>
    %cst_84 = arith.constant dense<0.000000e+00> : vector<8x128xf32>
    %171 = tpu.matmul %169, %170, %cst_84 {dimension_numbers = #tpu.dot_dimension_numbers<[1], [0], [0], [1], [0, 0, 1, 1], [], []>} : vector<8x48xf32>, vector<48x128xf32>, vector<8x128xf32> -> vector<8x128xf32>
    %c0_85 = arith.constant 0 : index
    %c0_86 = arith.constant 0 : index
    %172 = vector.load %arg14[%c0_85, %c0_86] : memref<1x128xf32, #tpu.memory_space<vmem>>, vector<1x128xf32>
    %173 = vector.broadcast %172 : vector<1x128xf32> to vector<8x128xf32>
    %174 = arith.addf %171, %173 : vector<8x128xf32>
    %c0_87 = arith.constant 0 : index
    %c0_88 = arith.constant 0 : index
    %175 = vector.load %arg15[%c0_87, %c0_88] : memref<8x128xf32, #tpu.memory_space<vmem>>, vector<8x128xf32>
    tpu.vector_store %arg15[%c0_87, %c0_88], %174 {strides = array<i32>} : memref<8x128xf32, #tpu.memory_space<vmem>>, vector<8x128xf32>,
    return
  }
  func.func @transform_0(%arg0: i32) -> (i32, i32) {
    %c0_i32 = arith.constant 0 : i32
    %c0_i32_0 = arith.constant 0 : i32
    return %arg0, %c0_i32 : i32, i32
  }
  func.func @transform_1(%arg0: i32) -> (i32, i32, i32) {
    %c0_i32 = arith.constant 0 : i32
    %c0_i32_0 = arith.constant 0 : i32
    %c0_i32_1 = arith.constant 0 : i32
    %c0_i32_2 = arith.constant 0 : i32
    return %c0_i32, %c0_i32_0, %c0_i32_1 : i32, i32, i32
  }
  func.func @transform_2(%arg0: i32) -> i32 {
    %c0_i32 = arith.constant 0 : i32
    %c0_i32_0 = arith.constant 0 : i32
    return %c0_i32 : i32
  }
  func.func @transform_3(%arg0: i32) -> i32 {
    %c0_i32 = arith.constant 0 : i32
    %c0_i32_0 = arith.constant 0 : i32
    return %c0_i32 : i32
  }
  func.func @transform_4(%arg0: i32) -> i32 {
    %c0_i32 = arith.constant 0 : i32
    %c0_i32_0 = arith.constant 0 : i32
    return %c0_i32 : i32
  }
  func.func @transform_5(%arg0: i32) -> (i32, i32) {
    %c0_i32 = arith.constant 0 : i32
    %c0_i32_0 = arith.constant 0 : i32
    %c0_i32_1 = arith.constant 0 : i32
    return %c0_i32, %c0_i32_0 : i32, i32
  }
  func.func @transform_6(%arg0: i32) -> (i32, i32) {
    %c0_i32 = arith.constant 0 : i32
    %c0_i32_0 = arith.constant 0 : i32
    %c0_i32_1 = arith.constant 0 : i32
    return %c0_i32, %c0_i32_0 : i32, i32
  }
  func.func @transform_7(%arg0: i32) -> (i32, i32, i32) {
    %c0_i32 = arith.constant 0 : i32
    %c0_i32_0 = arith.constant 0 : i32
    %c0_i32_1 = arith.constant 0 : i32
    %c0_i32_2 = arith.constant 0 : i32
    return %c0_i32, %c0_i32_0, %c0_i32_1 : i32, i32, i32
  }
  func.func @transform_8(%arg0: i32) -> (i32, i32) {
    %c0_i32 = arith.constant 0 : i32
    %c0_i32_0 = arith.constant 0 : i32
    %c0_i32_1 = arith.constant 0 : i32
    return %c0_i32, %c0_i32_0 : i32, i32
  }
  func.func @transform_9(%arg0: i32) -> (i32, i32) {
    %c0_i32 = arith.constant 0 : i32
    %c0_i32_0 = arith.constant 0 : i32
    %c0_i32_1 = arith.constant 0 : i32
    return %c0_i32, %c0_i32_0 : i32, i32
  }
  func.func @transform_10(%arg0: i32) -> (i32, i32) {
    %c0_i32 = arith.constant 0 : i32
    %c0_i32_0 = arith.constant 0 : i32
    %c0_i32_1 = arith.constant 0 : i32
    return %c0_i32, %c0_i32_0 : i32, i32
  }
  func.func @transform_11(%arg0: i32) -> (i32, i32) {
    %c0_i32 = arith.constant 0 : i32
    %c0_i32_0 = arith.constant 0 : i32
    %c0_i32_1 = arith.constant 0 : i32
    return %c0_i32, %c0_i32_0 : i32, i32
  }
  func.func @transform_12(%arg0: i32) -> (i32, i32) {
    %c0_i32 = arith.constant 0 : i32
    %c0_i32_0 = arith.constant 0 : i32
    %c0_i32_1 = arith.constant 0 : i32
    return %c0_i32, %c0_i32_0 : i32, i32
  }
  func.func @transform_13(%arg0: i32) -> (i32, i32) {
    %c0_i32 = arith.constant 0 : i32
    %c0_i32_0 = arith.constant 0 : i32
    %c0_i32_1 = arith.constant 0 : i32
    return %c0_i32, %c0_i32_0 : i32, i32
  }
  func.func @transform_14(%arg0: i32) -> (i32, i32) {
    %c0_i32 = arith.constant 0 : i32
    %c0_i32_0 = arith.constant 0 : i32
    return %arg0, %c0_i32 : i32, i32
  }
}

</mosaic_0001>

<bundles_post_ra>
// kernel: tpu_custom_call.1
= control target key start
LH: loop header
LB: loop body
LE: loop exit
PB: predicated region body
PF: predicated region fallthrough
CT: control target
= control target key end

     0   :  { %19 = vsyncpa [#allocation4], 0  ;;  %s2336_s0 = inlined_call_operand.vmem [shape: f32[8,192], index: 0, kind: input, shape index: {}]   ;;  %s2337_s1 = inlined_call_operand.vmem [shape: f32[6,192,64], index: 1, kind: input, shape index: {}]   ;;  %s2338_s2 = inlined_call_operand.vmem [shape: f32[3], index: 2, kind: input, shape index: {}]   ;;  %s2339_s3 = inlined_call_operand.vmem [shape: f32[12], index: 3, kind: input, shape index: {}]   ;;  %s2340_s4 = inlined_call_operand.vmem [shape: f32[4], index: 4, kind: input, shape index: {}]   ;;  %s2341_s5 = inlined_call_operand.vmem [shape: f32[64,64], index: 5, kind: input, shape index: {}]   ;;  %s2342_s6 = inlined_call_operand.vmem [shape: f32[64,64], index: 6, kind: input, shape index: {}]   ;;  %s2343_s7 = inlined_call_operand.vmem [shape: f32[4,64,96], index: 7, kind: input, shape index: {}]   ;;  %s2344_s8 = inlined_call_operand.vmem [shape: f32[192,96], index: 8, kind: input, shape index: {}]   ;;  %s2345_s9 = inlined_call_operand.vmem [shape: f32[1,96], index: 9, kind: input, shape index: {}]   ;;  %s2346_s10 = inlined_call_operand.vmem [shape: f32[96,48], index: 10, kind: input, shape index: {}]   ;;  %s2347_s11 = inlined_call_operand.vmem [shape: f32[1,48], index: 11, kind: input, shape index: {}]   ;;  %s2348_s12 = inlined_call_operand.vmem [shape: f32[48,128], index: 12, kind: input, shape index: {}]   ;;  %s2349_s13 = inlined_call_operand.vmem [shape: f32[1,128], index: 13, kind: input, shape index: {}]   ;;  %s2350_s14 = inlined_call_operand.hbm [shape: f32[8,128], index: 14, kind: output, shape index: {}]  }
   0x1   :  { %20 = vsyncpa [#allocation6], 0  ;;  %s40_s15 = sshll.u32 %s2339_s3, 4  ;;  %s41_s15 = int_to_ptr.vmem [resolvable:$true] %s40_s15 }
   0x2   :  { %21 = vsyncpa [#allocation3], 0  ;;  %s31_s18 = sshll.u32 %s2338_s2, 4  ;;  %s1303_s19 = smov [#allocation5]   ;;  %s32_s18 = int_to_ptr.vmem [resolvable:$true] %s31_s18 }
   0x3   :  { %43 = dma.vmem_to_smem %s41_s15, 16, %s1303_s19, [#allocation6]  }
   0x4   :  { %s1304_s20 = smov [#allocation2]   ;;  %s49_s23 = sshll.u32 %s2340_s4, 4  ;;  %s50_s23 = int_to_ptr.vmem [resolvable:$true] %s49_s23 }
   0x5   :  { %34 = dma.vmem_to_smem %s32_s18, 16, %s1304_s20, [#allocation4]  }
   0x6   :  { %s1305_s24 = smov [#allocation7]  }
   0x7   :  { %52 = dma.vmem_to_smem %s50_s23, 16, %s1305_s24, [#allocation6]  }
   0x8   :  { %1297 = dma.done.wait [#allocation4], 16  }
   0x9   :  { %1298 = vsyncadd [#allocation4], 4294967280 }
   0xa   :  { %1299 = dma.done.wait [#allocation6], 32  }
   0xb   :  { %1300 = vsyncadd [#allocation6], 4294967264 }
   0xc   :  { %83 = sfence }
   0xd   :  { %v1065_v0 = vld [vmem:[%s2337_s1 + $0x138] sm:$0xff]  ;;  %v1064_v1 = vld [vmem:[%s2337_s1 + $0x130] sm:$0xff]  ;;  %v1063_v4 = vld [vmem:[%s2337_s1 + $0x128] sm:$0xff]  ;;  %vm129_vm0 = vcmask 523264   ;;  %s1923_s4 = sld [smem:[#allocation5]]  ;;  %vm971_vm2 = vcmask 785408  }
   0xe   :  { %198 = vmatpush.msra.mxu2 %v1065_v0  ;;  %v120_v2 = vld [vmem:[%s2337_s1 + $0x78] sm:$0xff]  ;;  %v119_v3 = vld [vmem:[%s2337_s1 + $0x70] sm:$0xff]  ;;  %v118_v5 = vld [vmem:[%s2337_s1 + $0x68] sm:$0xff]  ;;  %s1933_s17 = sld [smem:[#allocation5 + $0x6]]  ;;  %vm1006_vm3 = vcmask 392192   ;;  %s1307_s27 = smov [#allocation8]  }
   0xf   :  { %133 = vmatpush.msra.mxu0 %v120_v2  ;;  %v1062_v6 = vld [vmem:[%s2337_s1 + $0x120] sm:$0xff]  ;;  %v1073_v8 = vld [vmem:[%s2337_s1 + $0x178] sm:$0xff]  ;;  %v1072_v10 = vld [vmem:[%s2337_s1 + $0x170] sm:$0xff]  ;;  %s1943_s22 = sld [smem:[#allocation5 + $0x9]]  ;;  %s1036_s28 = sshll.u32 %s1307_s27, 4  ;;  %s1037_s28 = int_to_ptr.vmem [resolvable:$true] %s1036_s28 }
  0x10   :  { %199 = vmatpush.msra.mxu2 %v1064_v1  ;;  %v117_v7 = vld [vmem:[%s2337_s1 + $0x60] sm:$0xff]  ;;  %v1061_v9 = vld [vmem:[%s2337_s1 + $0x118] sm:$0xff]  ;;  %226 = vmatpush.msra.mxu3 %v1073_v8  ;;  %v1071_v12 = vld [vmem:[%s2337_s1 + $0x168] sm:$0xff]  ;;  %s1946_s23 = sld [smem:[#allocation5 + $0x1]] }
  0x11   :  { %134 = vmatpush.msra.mxu0 %v119_v3  ;;  %v116_v11 = vld [vmem:[%s2337_s1 + $0x58] sm:$0xff]  ;;  %v1060_v14 = vld [vmem:[%s2337_s1 + $0x110] sm:$0xff]  ;;  %v1070_v16 = vld [vmem:[%s2337_s1 + $0x160] sm:$0xff]  ;;  %s1956_s26 = sld [smem:[#allocation5 + $0x4]] }
  0x12   :  { %200 = vmatpush.msra.mxu2 %v1063_v4  ;;  %v128_v13 = vld [vmem:[%s2337_s1 + $0xb8] sm:$0xff]  ;;  %227 = vmatpush.msra.mxu3 %v1072_v10  ;;  %v115_v15 = vld [vmem:[%s2337_s1 + $0x50] sm:$0xff]  ;;  %v1059_v18 = vld [vmem:[%s2337_s1 + $0x108] sm:$0xff]  ;;  %s1969_s30 = sld [smem:[#allocation5 + $0xa]] }
  0x13   :  { %135 = vmatpush.msra.mxu0 %v118_v5  ;;  %161 = vmatpush.msra.mxu1 %v128_v13  ;;  %v127_v17 = vld [vmem:[%s2337_s1 + $0xb0] sm:$0xff]  ;;  %v126_v19 = vld [vmem:[%s2337_s1 + $0xa8] sm:$0xff]  ;;  %v1069_v21 = vld [vmem:[%s2337_s1 + $0x158] sm:$0xff]  ;;  %s2059_s29 = sld [smem:[#allocation5 + $0x2]] }
  0x14   :  { %201 = vmatpush.msra.mxu2 %v1062_v6  ;;  %228 = vmatpush.msra.mxu3 %v1071_v12  ;;  %v114_v20 = vld [vmem:[%s2337_s1 + $0x48] sm:$0xff]  ;;  %v1058_v22 = vld [vmem:[%s2337_s1 + $0x100] sm:$0xff]  ;;  %v1068_v25 = vld [vmem:[%s2337_s1 + $0x150] sm:$0xff]  ;;  %s2064_s16 = sld [smem:[#allocation5 + $0x5]] }
  0x15   :  { %136 = vmatpush.msra.mxu0 %v117_v7  ;;  %162 = vmatpush.msra.mxu1 %v127_v17  ;;  %v125_v23 = vld [vmem:[%s2337_s1 + $0xa0] sm:$0xff]  ;;  %v1057_v26 = vld [vmem:[%s2337_s1 + $0xf8] sm:$0xff]  ;;  %v1067_v29 = vld [vmem:[%s2337_s1 + $0x148] sm:$0xff]  ;;  %s2066_s18 = sld [smem:[#allocation5 + $0x8]] }
  0x16   :  { %202 = vmatpush.msra.mxu2 %v1061_v9  ;;  %229 = vmatpush.msra.mxu3 %v1070_v16  ;;  %v113_v24 = vld [vmem:[%s2337_s1 + $0x40] sm:$0xff]  ;;  %v124_v27 = vld [vmem:[%s2337_s1 + $0x98] sm:$0xff]  ;;  %v1056_v30 = vld [vmem:[%s2337_s1 + $0xf0] sm:$0xff]  ;;  %s2077_s2 = sld [smem:[#allocation5 + $0xb]] }
  0x17   :  { %137 = vmatpush.msra.mxu0 %v116_v11  ;;  %163 = vmatpush.msra.mxu1 %v126_v19  ;;  %v112_v28 = vld [vmem:[%s2337_s1 + $0x38] sm:$0xff]  ;;  %v123_v31 = vld [vmem:[%s2337_s1 + $0x90] sm:$0xff]  ;;  %v1066_v33 = vld [vmem:[%s2337_s1 + $0x140] sm:$0xff]  ;;  %s2098_s15 = sld [smem:[#allocation7 + $0x2]] }
  0x18   :  { %203 = vmatpush.msra.mxu2 %v1060_v14  ;;  %230 = vmatpush.msra.mxu3 %v1069_v21  ;;  %v111_v32 = vld [vmem:[%s2337_s1 + $0x30] sm:$0xff]  ;;  %v1055_v34 = vld [vmem:[%s2337_s1 + $0xe8] sm:$0xff]  ;;  %v1054_v38 = vld [vmem:[%s2337_s1 + $0xe0] sm:$0xff] }
  0x19   :  { %138 = vmatpush.msra.mxu0 %v115_v15  ;;  %164 = vmatpush.msra.mxu1 %v125_v23  ;;  %v1500_v35 = vld [vmem:[%s2336_s0 + $0x8] sm:$0xff]  ;;  %v1091_v39 = vld [vmem:[%s2337_s1 + $0x1f8] sm:$0xff]  ;;  %v109_v40 = vld [vmem:[%s2337_s1 + $0x20] sm:$0xff] }
  0x1a   :  { %204 = vmatpush.msra.mxu2 %v1059_v18  ;;  %231 = vmatpush.msra.mxu3 %v1068_v25  ;;  %v110_v36 = vld [vmem:[%s2337_s1 + $0x28] sm:$0xff]  ;;  %v121_v41 = vld [vmem:[%s2337_s1 + $0x80] sm:$0xff]  ;;  %v1053_v42 = vld [vmem:[%s2337_s1 + $0xd8] sm:$0xff] }
  0x1b   :  { %139 = vmatpush.msra.mxu0 %v114_v20  ;;  %165 = vmatpush.msra.mxu1 %v124_v27  ;;  %v122_v37 = vld [vmem:[%s2337_s1 + $0x88] sm:$0xff]  ;;  %v108_v43 = vld [vmem:[%s2337_s1 + $0x18] sm:$0xff]  ;;  %v1052_v45 = vld [vmem:[%s2337_s1 + $0xd0] sm:$0xff] }
  0x1c   :  { %205 = vmatpush.msra.mxu2 %v1058_v22  ;;  %232 = vmatpush.msra.mxu3 %v1067_v29  ;;  %v1531_v44 = vld [vmem:[%s2341_s5 + $0x38] sm:$0xff]  ;;  %v1090_v46 = vld [vmem:[%s2337_s1 + $0x1f0] sm:$0xff]  ;;  %v1051_v49 = vld [vmem:[%s2337_s1 + $0xc8] sm:$0xff] }
  0x1d   :  { %140 = vmatpush.msra.mxu0 %v113_v24  ;;  %166 = vmatpush.msra.mxu1 %v123_v31  ;;  %v107_v47 = vld [vmem:[%s2337_s1 + $0x10] sm:$0xff]  ;;  %v1089_v50 = vld [vmem:[%s2337_s1 + $0x1e8] sm:$0xff]  ;;  %v1050_v53 = vld [vmem:[%s2337_s1 + $0xc0] sm:$0xff] }
  0x1e   :  { %206 = vmatpush.msra.mxu2 %v1057_v26  ;;  %233 = vmatpush.msra.mxu3 %v1066_v33  ;;  %v1547_v48 = vld [vmem:[%s2341_s5 + $0x30] sm:$0xff]  ;;  %v106_v51 = vld [vmem:[%s2337_s1 + $0x8] sm:$0xff]  ;;  %v1088_v54 = vld [vmem:[%s2337_s1 + $0x1e0] sm:$0xff] }
  0x1f   :  { %141 = vmatpush.msra.mxu0 %v112_v28  ;;  %1074 = vmatmul.msk.f32.vlgmr.msra.gmra.mxu3 %vm129_vm0, %v1500_v35  ;;  %v1562_v52 = vld [vmem:[%s2341_s5 + $0x28] sm:$0xff]  ;;  %v1574_v55 = vld [vmem:[%s2336_s0] sm:$0xff]  ;;  %v1087_v58 = vld [vmem:[%s2337_s1 + $0x1d8] sm:$0xff]  ;;  %s1959_s0 = sld [smem:[#allocation5 + $0x7]] }
  0x20   :  { %207 = vmatpush.msra.mxu2 %v1056_v30  ;;  %167 = vmatpush.msra.mxu1 %v122_v37  ;;  %v105_v56 = vld [vmem:[%s2337_s1] sm:$0xff]  ;;  %v1099_v59 = vld [vmem:[%s2337_s1 + $0x238] sm:$0xff]  ;;  %v1086_v61 = vld [vmem:[%s2337_s1 + $0x1d0] sm:$0xff] }
  0x21   :  { %142 = vmatpush.msra.mxu0 %v111_v32  ;;  %292 = vmatpush.msrb.mxu3 %v1091_v39  ;;  %v1583_v57 = vld [vmem:[%s2341_s5 + $0x20] sm:$0xff]  ;;  %v1595_v60 = vld [vmem:[%s2341_s5 + $0x18] sm:$0xff]  ;;  %v1098_v62 = vld [vmem:[%s2337_s1 + $0x230] sm:$0xff] }
  0x22   :  { %208 = vmatpush.msra.mxu2 %v1055_v34  ;;  %168 = vmatpush.msra.mxu1 %v121_v41  ;;  %v1608_v63 = vld [vmem:[%s2341_s5 + $0x10] sm:$0xff]  ;;  %v1085_v0 = vld [vmem:[%s2337_s1 + $0x1c8] sm:$0xff]  ;;  %v1084_v3 = vld [vmem:[%s2337_s1 + $0x1c0] sm:$0xff] }
  0x23   :  { %143 = vmatpush.msra.mxu0 %v110_v36  ;;  %1049 = vmatmul.msk.f32.vlgmr.msra.gmra.mxu1 %vm129_vm0, %v1500_v35  ;;  %v1097_v1 = vld [vmem:[%s2337_s1 + $0x228] sm:$0xff]  ;;  %v1096_v4 = vld [vmem:[%s2337_s1 + $0x220] sm:$0xff]  ;;  %v1116_v6 = vld [vmem:[%s2337_s1 + $0x2b8] sm:$0xff] }
  0x24   :  { %209 = vmatpush.msra.mxu2 %v1054_v38  ;;  %254 = vmatpush.msrb.mxu1 %v1531_v44  ;;  %v1621_v2 = vld [vmem:[%s2341_s5 + $0x8] sm:$0xff]  ;;  %v1634_v5 = vld [vmem:[%s2341_s5] sm:$0xff]  ;;  %v1083_v7 = vld [vmem:[%s2337_s1 + $0x1b8] sm:$0xff]  ;;  %s239_s5 = sld [smem:[#allocation2]] }
  0x25   :  { %144 = vmatpush.msra.mxu0 %v109_v40  ;;  %293 = vmatpush.msrb.mxu3 %v1090_v46  ;;  %v1095_v8 = vld [vmem:[%s2337_s1 + $0x218] sm:$0xff]  ;;  %v1115_v9 = vld [vmem:[%s2337_s1 + $0x2b0] sm:$0xff]  ;;  %v1114_v12 = vld [vmem:[%s2337_s1 + $0x2a8] sm:$0xff] }
  0x26   :  { %210 = vmatpush.msra.mxu2 %v1053_v42  ;;  %255 = vmatpush.msrb.mxu1 %v1547_v48  ;;  %v1082_v10 = vld [vmem:[%s2337_s1 + $0x1b0] sm:$0xff]  ;;  %v1081_v13 = vld [vmem:[%s2337_s1 + $0x1a8] sm:$0xff]  ;;  %v1113_v15 = vld [vmem:[%s2337_s1 + $0x2a0] sm:$0xff] }
  0x27   :  { %145 = vmatpush.msra.mxu0 %v108_v43  ;;  %294 = vmatpush.msrb.mxu3 %v1089_v50  ;;  %v1094_v11 = vld [vmem:[%s2337_s1 + $0x210] sm:$0xff]  ;;  %v1093_v14 = vld [vmem:[%s2337_s1 + $0x208] sm:$0xff]  ;;  %v1080_v16 = vld [vmem:[%s2337_s1 + $0x1a0] sm:$0xff] }
  0x28   :  { %211 = vmatpush.msra.mxu2 %v1052_v45  ;;  %256 = vmatpush.msrb.mxu1 %v1562_v52  ;;  %v1092_v17 = vld [vmem:[%s2337_s1 + $0x200] sm:$0xff]  ;;  %v1112_v18 = vld [vmem:[%s2337_s1 + $0x298] sm:$0xff]  ;;  %v1111_v21 = vld [vmem:[%s2337_s1 + $0x290] sm:$0xff] }
  0x29   :  { %146 = vmatpush.msra.mxu0 %v107_v47  ;;  %295 = vmatpush.msrb.mxu3 %v1088_v54  ;;  %v1079_v19 = vld [vmem:[%s2337_s1 + $0x198] sm:$0xff]  ;;  %v1078_v22 = vld [vmem:[%s2337_s1 + $0x190] sm:$0xff]  ;;  %v1110_v24 = vld [vmem:[%s2337_s1 + $0x288] sm:$0xff] }
  0x2a   :  { %212 = vmatpush.msra.mxu2 %v1051_v49  ;;  %257 = vmatpush.msrb.mxu1 %v1583_v57  ;;  %v1124_v20 = vld [vmem:[%s2337_s1 + $0x2f8] sm:$0xff]  ;;  %v1123_v23 = vld [vmem:[%s2337_s1 + $0x2f0] sm:$0xff]  ;;  %v1077_v25 = vld [vmem:[%s2337_s1 + $0x188] sm:$0xff] }
  0x2b   :  { %147 = vmatpush.msra.mxu0 %v106_v51  ;;  %296 = vmatpush.msrb.mxu3 %v1087_v58  ;;  %v1109_v26 = vld [vmem:[%s2337_s1 + $0x280] sm:$0xff]  ;;  %v1122_v27 = vld [vmem:[%s2337_s1 + $0x2e8] sm:$0xff]  ;;  %v1108_v29 = vld [vmem:[%s2337_s1 + $0x278] sm:$0xff] }
  0x2c   :  { %213 = vmatpush.msra.mxu2 %v1050_v53  ;;  %258 = vmatpush.msrb.mxu1 %v1595_v60  ;;  %v1076_v28 = vld [vmem:[%s2337_s1 + $0x180] sm:$0xff]  ;;  %v1107_v31 = vld [vmem:[%s2337_s1 + $0x270] sm:$0xff]  ;;  %v1120_v32 = vld [vmem:[%s2337_s1 + $0x2d8] sm:$0xff] }
  0x2d   :  { %214 = vmatmul.f32.vlgmr.msra.gmra.mxu2 %v1574_v55  ;;  %148 = vmatpush.msra.mxu0 %v105_v56  ;;  %v1121_v30 = vld [vmem:[%s2337_s1 + $0x2e0] sm:$0xff]  ;;  %v1106_v33 = vld [vmem:[%s2337_s1 + $0x268] sm:$0xff]  ;;  %v1119_v34 = vld [vmem:[%s2337_s1 + $0x2d0] sm:$0xff] }
  0x2e   :  { %149 = vmatmul.f32.vlgmr.msra.gmra.mxu0 %v1574_v55  ;;  %320 = vmatpush.msrb.mxu2 %v1099_v59  ;;  %v1105_v36 = vld [vmem:[%s2337_s1 + $0x260] sm:$0xff]  ;;  %v1118_v37 = vld [vmem:[%s2337_s1 + $0x2c8] sm:$0xff]  ;;  %v1104_v38 = vld [vmem:[%s2337_s1 + $0x258] sm:$0xff] }
  0x2f   :  { %413 = vmatpush.msrb.mxu0 %v1531_v44  ;;  %297 = vmatpush.msrb.mxu3 %v1086_v61  ;;  %v1117_v39 = vld [vmem:[%s2337_s1 + $0x2c0] sm:$0xff]  ;;  %v1103_v40 = vld [vmem:[%s2337_s1 + $0x250] sm:$0xff]  ;;  %v1102_v41 = vld [vmem:[%s2337_s1 + $0x248] sm:$0xff] }
  0x30   :  { %321 = vmatpush.msrb.mxu2 %v1098_v62  ;;  %259 = vmatpush.msrb.mxu1 %v1608_v63  ;;  %v1101_v42 = vld [vmem:[%s2337_s1 + $0x240] sm:$0xff]  ;;  %v1143_v43 = vld [vmem:[%s2337_s1 + $0x378] sm:$0xff]  ;;  %v1142_v45 = vld [vmem:[%s2337_s1 + $0x370] sm:$0xff] }
  0x31   :  { %414 = vmatpush.msrb.mxu0 %v1547_v48  ;;  %298 = vmatpush.msrb.mxu3 %v1085_v0  ;;  %v1168_v46 = vld [vmem:[%s2337_s1 + $0x438] sm:$0xff]  ;;  %v1141_v47 = vld [vmem:[%s2337_s1 + $0x368] sm:$0xff]  ;;  %v1167_v49 = vld [vmem:[%s2337_s1 + $0x430] sm:$0xff] }
  0x32   :  { %322 = vmatpush.msrb.mxu2 %v1097_v1  ;;  %260 = vmatpush.msrb.mxu1 %v1621_v2  ;;  %v1166_v50 = vld [vmem:[%s2337_s1 + $0x428] sm:$0xff]  ;;  %v1140_v51 = vld [vmem:[%s2337_s1 + $0x360] sm:$0xff]  ;;  %v1139_v53 = vld [vmem:[%s2337_s1 + $0x358] sm:$0xff]  ;;  %v240_v1 = vstv %s239_s5  ;;  %s1931_s5 = sld [smem:[#allocation5 + $0x3]] }
  0x33   :  { %415 = vmatpush.msrb.mxu0 %v1562_v52  ;;  %299 = vmatpush.msrb.mxu3 %v1084_v3  ;;  %v1138_v54 = vld [vmem:[%s2337_s1 + $0x350] sm:$0xff] }
  0x34   :  { %323 = vmatpush.msrb.mxu2 %v1096_v4  ;;  %261 = vmatpush.msrb.mxu1 %v1634_v5 }
  0x35   :  { %416 = vmatpush.msrb.mxu0 %v1583_v57  ;;  %300 = vmatpush.msrb.mxu3 %v1083_v7  ;;  %v1137_v7 = vld [vmem:[%s2337_s1 + $0x348] sm:$0xff] }
  0x36   :  { %357 = vmatpush.msra.mxu1 %v1116_v6  ;;  %324 = vmatpush.msrb.mxu2 %v1095_v8  ;;  %v1165_v8 = vld [vmem:[%s2337_s1 + $0x420] sm:$0xff] }
  0x37   :  { %417 = vmatpush.msrb.mxu0 %v1595_v60  ;;  %301 = vmatpush.msrb.mxu3 %v1082_v10  ;;  %v1164_v10 = vld [vmem:[%s2337_s1 + $0x418] sm:$0xff] }
  0x38   :  { %358 = vmatpush.msra.mxu1 %v1115_v9  ;;  %325 = vmatpush.msrb.mxu2 %v1094_v11  ;;  %v1136_v9 = vld [vmem:[%s2337_s1 + $0x340] sm:$0xff]  ;;  %v1135_v11 = vld [vmem:[%s2337_s1 + $0x338] sm:$0xff] }
  0x39   :  { %418 = vmatpush.msrb.mxu0 %v1608_v63  ;;  %302 = vmatpush.msrb.mxu3 %v1081_v13  ;;  %v1163_v13 = vld [vmem:[%s2337_s1 + $0x410] sm:$0xff] }
  0x3a   :  { %359 = vmatpush.msra.mxu1 %v1114_v12  ;;  %326 = vmatpush.msrb.mxu2 %v1093_v14  ;;  %v1151_v12 = vld [vmem:[%s2337_s1 + $0x3b8] sm:$0xff]  ;;  %v1134_v14 = vld [vmem:[%s2337_s1 + $0x330] sm:$0xff] }
  0x3b   :  { %419 = vmatpush.msrb.mxu0 %v1621_v2  ;;  %303 = vmatpush.msrb.mxu3 %v1080_v16  ;;  %v1162_v16 = vld [vmem:[%s2337_s1 + $0x408] sm:$0xff] }
  0x3c   :  { %360 = vmatpush.msra.mxu1 %v1113_v15  ;;  %327 = vmatpush.msrb.mxu2 %v1092_v17  ;;  %v1150_v15 = vld [vmem:[%s2337_s1 + $0x3b0] sm:$0xff]  ;;  %v1133_v17 = vld [vmem:[%s2337_s1 + $0x328] sm:$0xff] }
  0x3d   :  { %420 = vmatpush.msrb.mxu0 %v1634_v5  ;;  %304 = vmatpush.msrb.mxu3 %v1079_v19  ;;  %v1161_v19 = vld [vmem:[%s2337_s1 + $0x400] sm:$0xff] }
  0x3e   :  { %361 = vmatpush.msra.mxu1 %v1112_v18  ;;  %385 = vmatpush.msra.mxu2 %v1124_v20  ;;  %v1149_v18 = vld [vmem:[%s2337_s1 + $0x3a8] sm:$0xff]  ;;  %v1132_v20 = vld [vmem:[%s2337_s1 + $0x320] sm:$0xff] }
  0x3f   :  { %305 = vmatpush.msrb.mxu3 %v1078_v22  ;;  %1100 = vmatmul.msk.f32.vlgmr.msrb.gmra.mxu2 %vm129_vm0, %v1500_v35  ;;  %v1160_v22 = vld [vmem:[%s2337_s1 + $0x3f8] sm:$0xff] }
  0x40   :  { %362 = vmatpush.msra.mxu1 %v1111_v21  ;;  %386 = vmatpush.msra.mxu2 %v1123_v23  ;;  %v1148_v21 = vld [vmem:[%s2337_s1 + $0x3a0] sm:$0xff]  ;;  %v1176_v23 = vld [vmem:[%s2337_s1 + $0x478] sm:$0xff] }
  0x41   :  { %306 = vmatpush.msrb.mxu3 %v1077_v25  ;;  %516 = vmatpush.msra.mxu0 %v1168_v46  ;;  %v1147_v25 = vld [vmem:[%s2337_s1 + $0x398] sm:$0xff]  ;;  %v1153_v46 = vld [vmem:[%s2337_s1 + $0x3c0] sm:$0xff] }
  0x42   :  { %363 = vmatpush.msra.mxu1 %v1110_v24  ;;  %387 = vmatpush.msra.mxu2 %v1122_v27  ;;  %v1131_v24 = vld [vmem:[%s2337_s1 + $0x318] sm:$0xff]  ;;  %v1175_v27 = vld [vmem:[%s2337_s1 + $0x470] sm:$0xff] }
  0x43   :  { %307 = vmatpush.msrb.mxu3 %v1076_v28  ;;  %517 = vmatpush.msra.mxu0 %v1167_v49  ;;  %v1130_v28 = vld [vmem:[%s2337_s1 + $0x310] sm:$0xff] }
  0x44   :  { %364 = vmatpush.msra.mxu1 %v1109_v26  ;;  %388 = vmatpush.msra.mxu2 %v1121_v30  ;;  %v1159_v26 = vld [vmem:[%s2337_s1 + $0x3f0] sm:$0xff]  ;;  %v1158_v30 = vld [vmem:[%s2337_s1 + $0x3e8] sm:$0xff] }
  0x45   :  { %308 = vmatmul.f32.vlgmr.msrb.gmra.mxu3 %v1574_v55  ;;  %518 = vmatpush.msra.mxu0 %v1166_v50 }
  0x46   :  { %365 = vmatpush.msra.mxu1 %v1108_v29  ;;  %389 = vmatpush.msra.mxu2 %v1120_v32  ;;  %v1146_v29 = vld [vmem:[%s2337_s1 + $0x390] sm:$0xff]  ;;  %v1129_v32 = vld [vmem:[%s2337_s1 + $0x308] sm:$0xff] }
  0x47   :  { %519 = vmatpush.msra.mxu0 %v1165_v8  ;;  %479 = vmatpush.msra.mxu3 %v1151_v12  ;;  %v1987_v8 = vld [vmem:[%s2342_s6 + $0x18] sm:$0xff]  ;;  %v656_v12 = vstv %s1923_s4 }
  0x48   :  { %366 = vmatpush.msra.mxu1 %v1107_v31  ;;  %390 = vmatpush.msra.mxu2 %v1119_v34  ;;  %v1174_v31 = vld [vmem:[%s2337_s1 + $0x468] sm:$0xff]  ;;  %v1157_v34 = vld [vmem:[%s2337_s1 + $0x3e0] sm:$0xff] }
  0x49   :  { %520 = vmatpush.msra.mxu0 %v1164_v10  ;;  %480 = vmatpush.msra.mxu3 %v1150_v15  ;;  %v1996_v10 = vld [vmem:[%s2342_s6 + $0x10] sm:$0xff]  ;;  %v882_v15 = vstv %s1943_s22 }
  0x4a   :  { %367 = vmatpush.msra.mxu1 %v1106_v33  ;;  %391 = vmatpush.msra.mxu2 %v1118_v37  ;;  %v1145_v33 = vld [vmem:[%s2337_s1 + $0x388] sm:$0xff]  ;;  %v1128_v37 = vld [vmem:[%s2337_s1 + $0x300] sm:$0xff] }
  0x4b   :  { %521 = vmatpush.msra.mxu0 %v1163_v13  ;;  %481 = vmatpush.msra.mxu3 %v1149_v18  ;;  %v732_v13 = vstv %s1931_s5  ;;  %v735_v18 = vstv %s1956_s26  ;;  %s2085_s5 = sld [smem:[#allocation7]] }
  0x4c   :  { %368 = vmatpush.msra.mxu1 %v1105_v36  ;;  %392 = vmatpush.msra.mxu2 %v1117_v39  ;;  %v1173_v36 = vld [vmem:[%s2337_s1 + $0x460] sm:$0xff]  ;;  %v1156_v39 = vld [vmem:[%s2337_s1 + $0x3d8] sm:$0xff]  ;;  %s2093_s26 = sld [smem:[#allocation7 + $0x1]] }
  0x4d   :  { %1125 = vmatmul.msk.f32.vlgmr.msra.gmra.mxu2 %vm129_vm0, %v1500_v35  ;;  %522 = vmatpush.msra.mxu0 %v1162_v16 }
  0x4e   :  { %369 = vmatpush.msra.mxu1 %v1104_v38  ;;  %451 = vmatpush.msrb.mxu2 %v1143_v43  ;;  %v1144_v38 = vld [vmem:[%s2337_s1 + $0x380] sm:$0xff]  ;;  %v1154_v43 = vld [vmem:[%s2337_s1 + $0x3c8] sm:$0xff] }
  0x4f   :  { %523 = vmatpush.msra.mxu0 %v1161_v19  ;;  %482 = vmatpush.msra.mxu3 %v1148_v21  ;;  %v810_v19 = vstv %s1959_s0 }
  0x50   :  { %370 = vmatpush.msra.mxu1 %v1103_v40  ;;  %452 = vmatpush.msrb.mxu2 %v1142_v45  ;;  %v1172_v40 = vld [vmem:[%s2337_s1 + $0x458] sm:$0xff]  ;;  %v1170_v45 = vld [vmem:[%s2337_s1 + $0x448] sm:$0xff] }
  0x51   :  { %524 = vmatpush.msra.mxu0 %v1160_v22  ;;  %483 = vmatpush.msra.mxu3 %v1147_v25 }
  0x52   :  { %371 = vmatpush.msra.mxu1 %v1102_v41  ;;  %453 = vmatpush.msrb.mxu2 %v1141_v47  ;;  %v1155_v41 = vld [vmem:[%s2337_s1 + $0x3d0] sm:$0xff]  ;;  %v1169_v47 = vld [vmem:[%s2337_s1 + $0x440] sm:$0xff] }
  0x53   :  { %525 = vmatpush.msra.mxu0 %v1159_v26  ;;  %484 = vmatpush.msra.mxu3 %v1146_v29 }
  0x54   :  { %372 = vmatpush.msra.mxu1 %v1101_v42  ;;  %454 = vmatpush.msrb.mxu2 %v1140_v51  ;;  %v1171_v42 = vld [vmem:[%s2337_s1 + $0x450] sm:$0xff]  ;;  %s1126_s1 = sld [smem:[#allocation2 + $0x1]] }
  0x55   :  { %526 = vmatpush.msra.mxu0 %v1158_v30  ;;  %485 = vmatpush.msra.mxu3 %v1145_v33 }
  0x56   :  { %455 = vmatpush.msrb.mxu2 %v1139_v53 }
  0x57   :  { %527 = vmatpush.msra.mxu0 %v1157_v34  ;;  %486 = vmatpush.msra.mxu3 %v1144_v38 }
  0x58   :  { %456 = vmatpush.msrb.mxu2 %v1138_v54  ;;  %1152 = vmatmul.msk.f32.vlgmr.msra.gmra.mxu3 %vm129_vm0, %v1500_v35 }
  0x59   :  { %528 = vmatpush.msra.mxu0 %v1156_v39  ;;  %572 = vmatpush.msrb.mxu3 %v1531_v44 }
  0x5a   :  { %457 = vmatpush.msrb.mxu2 %v1137_v7  ;;  %v602_v7 = vld [vmem:[%s2344_s8 + $0x88] sm:$0xff] }
  0x5b   :  { %529 = vmatpush.msra.mxu0 %v1155_v41  ;;  %573 = vmatpush.msrb.mxu3 %v1547_v48 }
  0x5c   :  { %458 = vmatpush.msrb.mxu2 %v1136_v9  ;;  %v601_v9 = vld [vmem:[%s2344_s8 + $0x80] sm:$0xff] }
  0x5d   :  { %530 = vmatpush.msra.mxu0 %v1154_v43  ;;  %574 = vmatpush.msrb.mxu3 %v1562_v52  ;;  %v2041_v43 = vld [vmem:[%s2342_s6] sm:$0xff] }
  0x5e   :  { %459 = vmatpush.msrb.mxu2 %v1135_v11 }
  0x5f   :  { %531 = vmatpush.msra.mxu0 %v1153_v46  ;;  %575 = vmatpush.msrb.mxu3 %v1583_v57  ;;  %v608_v57 = vld [vmem:[%s2344_s8 + $0xb8] sm:$0xff]  ;;  %v599_v46 = vld [vmem:[%s2344_s8 + $0x70] sm:$0xff] }
  0x60   :  { %460 = vmatpush.msrb.mxu2 %v1134_v14  ;;  %v807_v14 = vstv %s1933_s17 }
  0x61   :  { %576 = vmatpush.msrb.mxu3 %v1595_v60  ;;  %v607_v60 = vld [vmem:[%s2344_s8 + $0xb0] sm:$0xff] }
  0x62   :  { %461 = vmatpush.msrb.mxu2 %v1133_v17  ;;  %v659_v17 = vstv %s1946_s23 }
  0x63   :  { %577 = vmatpush.msrb.mxu3 %v1608_v63  ;;  %v606_v63 = vld [vmem:[%s2344_s8 + $0xa8] sm:$0xff] }
  0x64   :  { %462 = vmatpush.msrb.mxu2 %v1132_v20  ;;  %v885_v20 = vstv %s1969_s30 }
  0x65   :  { %578 = vmatpush.msrb.mxu3 %v1621_v2  ;;  %v1941_v2 = vld [vmem:[%s2342_s6 + $0x38] sm:$0xff] }
  0x66   :  { %463 = vmatpush.msrb.mxu2 %v1131_v24 }
  0x67   :  { %579 = vmatpush.msrb.mxu3 %v1634_v5  ;;  %v605_v5 = vld [vmem:[%s2344_s8 + $0xa0] sm:$0xff] }
  0x68   :  { %464 = vmatpush.msrb.mxu2 %v1130_v28 }
  0x69   :  { %681 = vmatpush.msra.mxu3 %v1941_v2 }
  0x6a   :  { %465 = vmatpush.msrb.mxu2 %v1129_v32 }
  0x6c   :  { %466 = vmatpush.msrb.mxu2 %v1128_v37 }
  0x6d   :  { %467 = vmatmul.f32.vlgmr.msrb.gmra.mxu2 %v1574_v55 }
  0x6e   :  { %641 = vmatpush.msra.mxu2 %v608_v57  ;;  %v594_v57 = vld [vmem:[%s2344_s8 + $0x48] sm:$0xff] }
  0x70   :  { %642 = vmatpush.msra.mxu2 %v607_v60  ;;  %v700_v60 = vld [vmem:[%s2343_s7 + $0x18] sm:$0xff] }
  0x72   :  { %643 = vmatpush.msra.mxu2 %v606_v63  ;;  %v1193_v63 = vld [vmem:[%s2343_s7 + $0x58] sm:$0xff] }
  0x74   :  { %644 = vmatpush.msra.mxu2 %v605_v5  ;;  %v593_v5 = vld [vmem:[%s2344_s8 + $0x40] sm:$0xff] }
  0xa0   :  { %v170_v58 = vpop.f32.mrf.mxu1 }
  0xa2   :  { %v235_v59 = vpop.f32.mrf.mxu3 }
  0xab   :  { %v150_v56 = vpop.f32.mrf.mxu0 }
  0xac   :  { %v171_v61 = vadd.f32 %v170_v58, %v150_v56  ;;  %v399_v56 = vstv %s1126_s1  ;;  %s1178_s1 = sld [smem:[#allocation2 + $0x2]] }
  0xb0   :  { %v215_v62 = vpop.f32.mrf.mxu2 }
  0xb1   :  { %v236_v0 = vadd.f32 %v235_v59, %v215_v62  ;;  %v604_v62 = vld [vmem:[%s2344_s8 + $0x98] sm:$0xff] }
  0xb2   :  { %645 = vmatpush.msra.mxu2 %v604_v62  ;;  %v558_v38 = vstv %s1178_s1  ;;  %v699_v62 = vld [vmem:[%s2343_s7 + $0x10] sm:$0xff] }
  0xb3   :  { %v238_v3 = vmax.f32 %v171_v61, %v236_v0  ;;  %v1954_v61 = vld [vmem:[%s2342_s6 + $0x30] sm:$0xff]  ;;  %v1967_v0 = vld [vmem:[%s2342_s6 + $0x28] sm:$0xff] }
  0xb4   :  { %682 = vmatpush.msra.mxu3 %v1954_v61 }
  0xb5   :  { %v1784_v4 = vadd.f32 %v240_v1, %v238_v3  ;;  %v603_v1 = vld [vmem:[%s2344_s8 + $0x90] sm:$0xff]  ;;  %v1978_v3 = vld [vmem:[%s2342_s6 + $0x20] sm:$0xff] }
  0xb6   :  { %683 = vmatpush.msra.mxu3 %v1967_v0  ;;  %646 = vmatpush.msra.mxu2 %v603_v1 }
  0xb7   :  { %v242_v6 = vmax.f32 %v1784_v4, 0.0 }
  0xb8   :  { %684 = vmatpush.msra.mxu3 %v1978_v3  ;;  %647 = vmatpush.msra.mxu2 %v602_v7  ;;  %v663_v7 = vstv %s2059_s29  ;;  %s2138_s29 = sld [smem:[#allocation7 + $0x3]] }
  0xb9   :  { %1075 = vmatmul.msk.f32.vlgmr.msrb.gmra.mxu1 %vm129_vm0, %v242_v6 }
  0xba   :  { %544 = vmatpush.msrb.mxu1 %v1176_v23  ;;  %685 = vmatpush.msra.mxu3 %v1987_v8 }
  0xbb   :  { %648 = vmatpush.msra.mxu2 %v601_v9  ;;  %v739_v9 = vstv %s2064_s16  ;;  %s1306_s16 = smov 0.0  }
  0xbc   :  { %545 = vmatpush.msrb.mxu1 %v1175_v27  ;;  %686 = vmatpush.msra.mxu3 %v1996_v10  ;;  %s2150_s1 = smax.f32 %s1306_s16, %s2093_s26 }
  0xbd   :  { %757 = vmatpush.msrb.mxu2 %v1941_v2 }
  0xbe   :  { %546 = vmatpush.msrb.mxu1 %v1174_v31  ;;  %1180 = vmatmul.msk.f32.vlgmr.msra.gmra.mxu2 %vm129_vm0, %v1500_v35  ;;  %s880_s3 = smax.f32 %s1306_s16, %s2138_s29 }
  0xbf   :  { %758 = vmatpush.msrb.mxu2 %v1954_v61 }
  0xc0   :  { %547 = vmatpush.msrb.mxu1 %v1173_v36 }
  0xc1   :  { %373 = vmatmul.f32.vlgmr.msra.gmra.mxu1 %v1574_v55  ;;  %759 = vmatpush.msrb.mxu2 %v1967_v0 }
  0xc2   :  { %548 = vmatpush.msrb.mxu1 %v1172_v40  ;;  %v329_v49 = vpop.f32.mrf.mxu2 }
  0xc3   :  { %760 = vmatpush.msrb.mxu2 %v1978_v3 }
  0xc4   :  { %549 = vmatpush.msrb.mxu1 %v1171_v42  ;;  %v2034_v42 = vld [vmem:[%s2342_s6 + $0x8] sm:$0xff]  ;;  %s2160_s6 = smax.f32 %s1306_s16, %s2098_s15 }
  0xc5   :  { %761 = vmatpush.msrb.mxu2 %v1987_v8  ;;  %687 = vmatpush.msra.mxu3 %v2034_v42 }
  0xc6   :  { %550 = vmatpush.msrb.mxu1 %v1170_v45  ;;  %v600_v45 = vld [vmem:[%s2344_s8 + $0x78] sm:$0xff] }
  0xc7   :  { %762 = vmatpush.msrb.mxu2 %v1996_v10  ;;  %688 = vmatpush.msra.mxu3 %v2041_v43 }
  0xc8   :  { %551 = vmatpush.msrb.mxu1 %v1169_v47  ;;  %v309_v44 = vpop.f32.mrf.mxu3  ;;  %v598_v47 = vld [vmem:[%s2344_s8 + $0x68] sm:$0xff] }
  0xc9   :  { %1177 = vmatmul.msk.f32.vlgmr.msrb.gmra.mxu1 %vm129_vm0, %v1500_v35  ;;  %v330_v53 = vadd.f32 %v329_v49, %v309_v44  ;;  %763 = vmatpush.msrb.mxu2 %v2034_v42  ;;  %v597_v49 = vld [vmem:[%s2344_s8 + $0x60] sm:$0xff]  ;;  %v1197_v44 = vld [vmem:[%s2343_s7 + $0x78] sm:$0xff] }
  0xca   :  { %613 = vmatpush.msra.mxu1 %v600_v45  ;;  %v1225_v45 = vld [vmem:[%s2343_s7 + $0xf8] sm:$0xff] }
  0xcb   :  { %764 = vmatpush.msrb.mxu2 %v2041_v43 }
  0xcc   :  { %614 = vmatpush.msra.mxu1 %v599_v46 }
  0xcd   :  { %907 = vmatpush.msra.mxu2 %v1941_v2 }
  0xce   :  { %615 = vmatpush.msra.mxu1 %v598_v47  ;;  %v892_v47 = vstv %s2138_s29 }
  0xcf   :  { %908 = vmatpush.msra.mxu2 %v1954_v61 }
  0xd0   :  { %v394_v48 = vpop.f32.mrf.mxu2  ;;  %616 = vmatpush.msra.mxu1 %v597_v49 }
  0xd1   :  { %909 = vmatpush.msra.mxu2 %v1967_v0 }
  0xd3   :  { %910 = vmatpush.msra.mxu2 %v1978_v3 }
  0xd5   :  { %911 = vmatpush.msra.mxu2 %v1987_v8 }
  0xd7   :  { %912 = vmatpush.msra.mxu2 %v1996_v10 }
  0xd9   :  { %913 = vmatpush.msra.mxu2 %v2034_v42 }
  0xdb   :  { %v488_v29 = vpop.f32.mrf.mxu3  ;;  %914 = vmatpush.msra.mxu2 %v2041_v43 }
  0xf0   :  { %v468_v28 = vpop.f32.mrf.mxu2 }
  0xf1   :  { %v489_v35 = vadd.f32 %v488_v29, %v468_v28  ;;  %v590_v29 = vld [vmem:[%s2344_s8 + $0x28] sm:$0xff] }
 0x136   :  { %v263_v50 = vpop.f32.mrf.mxu1 }
 0x137   :  { %v266_v11 = vmax.f32 %v242_v6, %v263_v50  ;;  %v704_v50 = vld [vmem:[%s2343_s7 + $0x38] sm:$0xff] }
 0x139   :  { %v657_v22 = vmul.f32 %v656_v12, %v266_v11  ;;  %v733_v23 = vmul.f32 %v732_v13, %v266_v11  ;;  %v808_v4 = vmul.f32 %v807_v14, %v266_v11  ;;  %v883_v6 = vmul.f32 %v882_v15, %v266_v11  ;;  %v1192_v12 = vld [vmem:[%s2343_s7 + $0x50] sm:$0xff]  ;;  %v592_v14 = vld [vmem:[%s2344_s8 + $0x38] sm:$0xff]  ;;  %v698_v15 = vld [vmem:[%s2343_s7 + $0x8] sm:$0xff] }
 0x13a   :  { %v814_v11 = vstv %s2066_s18  ;;  %s2143_s18 = smax.f32 %s1306_s16, %s2085_s5 }
 0x13e   :  { %v374_v51 = vpop.f32.mrf.mxu1 }
 0x13f   :  { %v395_v54 = vadd.f32 %v394_v48, %v374_v51  ;;  %v703_v48 = vld [vmem:[%s2343_s7 + $0x30] sm:$0xff] }
 0x140   :  { %v1196_v51 = vld [vmem:[%s2343_s7 + $0x70] sm:$0xff] }
 0x141   :  { %v397_v52 = vmax.f32 %v330_v53, %v395_v54  ;;  %v596_v53 = vld [vmem:[%s2344_s8 + $0x58] sm:$0xff]  ;;  %v702_v54 = vld [vmem:[%s2343_s7 + $0x28] sm:$0xff] }
 0x142   :  { %617 = vmatpush.msra.mxu1 %v596_v53  ;;  %v650_v53 = vpop.f32.mrf.mxu2 }
 0x143   :  { %v400_v58 = vadd.f32 %v399_v56, %v397_v52  ;;  %v1195_v56 = vld [vmem:[%s2343_s7 + $0x68] sm:$0xff]  ;;  %v595_v52 = vld [vmem:[%s2344_s8 + $0x50] sm:$0xff] }
 0x144   :  { %618 = vmatpush.msra.mxu1 %v595_v52 }
 0x145   :  { %v401_v59 = vmax.f32 %v400_v58, 0.0  ;;  %v701_v58 = vld [vmem:[%s2343_s7 + $0x20] sm:$0xff] }
 0x146   :  { %v553_v34 = vpop.f32.mrf.mxu1  ;;  %619 = vmatpush.msra.mxu1 %v594_v57 }
 0x147   :  { %1127 = vmatmul.msk.f32.vlgmr.msrb.gmra.mxu0 %vm129_vm0, %v401_v59 }
 0x148   :  { %716 = vmatpush.msrb.mxu0 %v704_v50  ;;  %620 = vmatpush.msra.mxu1 %v593_v5  ;;  %v894_v50 = vstv %s880_s3 }
 0x14a   :  { %717 = vmatpush.msrb.mxu0 %v703_v48  ;;  %621 = vmatpush.msra.mxu1 %v592_v14  ;;  %v1204_v14 = vld [vmem:[%s2343_s7 + $0x80] sm:$0xff] }
 0x14c   :  { %718 = vmatpush.msrb.mxu0 %v702_v54  ;;  %v102_v54 = vlaneseq }
 0x14e   :  { %719 = vmatpush.msrb.mxu0 %v701_v58 }
 0x14f   :  { %532 = vmatmul.f32.vlgmr.msra.gmra.mxu0 %v1574_v55 }
 0x150   :  { %720 = vmatpush.msrb.mxu0 %v700_v60 }
 0x152   :  { %721 = vmatpush.msrb.mxu0 %v699_v62 }
 0x154   :  { %722 = vmatpush.msrb.mxu0 %v698_v15  ;;  %v966_v15 = vld [vmem:[%s2346_s10 + $0x58] sm:$0xff] }
 0x1c4   :  { %v422_v16 = vpop.f32.mrf.mxu0 }
 0x1c5   :  { %v425_v21 = vmax.f32 %v401_v59, %v422_v16  ;;  %v1194_v59 = vld [vmem:[%s2343_s7 + $0x60] sm:$0xff]  ;;  %v889_v16 = vstv %s2077_s2 }
 0x1c7   :  { %v660_v24 = vmul.f32 %v659_v17, %v425_v21  ;;  %v736_v25 = vmul.f32 %v735_v18, %v425_v21  ;;  %v811_v26 = vmul.f32 %v810_v19, %v425_v21  ;;  %v886_v27 = vmul.f32 %v885_v20, %v425_v21  ;;  %v1191_v17 = vld [vmem:[%s2343_s7 + $0x48] sm:$0xff]  ;;  %v591_v21 = vld [vmem:[%s2344_s8 + $0x30] sm:$0xff] }
 0x1c8   :  { %622 = vmatpush.msra.mxu1 %v591_v21  ;;  %v1234_v21 = vld [vmem:[%s2345_s9] ss:$0 sm:$0xff] }
 0x1c9   :  { %v2013_v30 = vadd.f32 %v660_v24, %v657_v22  ;;  %v2015_v31 = vadd.f32 %v736_v25, %v733_v23  ;;  %v2017_v32 = vadd.f32 %v811_v26, %v808_v4  ;;  %v2019_v33 = vadd.f32 %v886_v27, %v883_v6  ;;  %v697_v22 = vld [vmem:[%s2343_s7] sm:$0xff] }
 0x1ca   :  { %v666_v23 = vstv %s2085_s5  ;;  %v742_v4 = vstv %s2093_s26  ;;  %v817_v6 = vstv %s2098_s15  ;;  %v1190_v24 = vld [vmem:[%s2343_s7 + $0x40] sm:$0xff]  ;;  %723 = vmatpush.msrb.mxu0 %v697_v22  ;;  %623 = vmatpush.msra.mxu1 %v590_v29 }
 0x1cc   :  { %v533_v36 = vpop.f32.mrf.mxu0  ;;  %832 = vmatpush.msra.mxu0 %v1941_v2  ;;  %v587_v2 = vld [vmem:[%s2344_s8 + $0x10] sm:$0xff] }
 0x1cd   :  { %v554_v37 = vadd.f32 %v553_v34, %v533_v36  ;;  %v668_v34 = vstv %s2143_s18  ;;  %v819_v36 = vstv %s2160_s6 }
 0x1ce   :  { %833 = vmatpush.msra.mxu0 %v1954_v61  ;;  %v586_v61 = vld [vmem:[%s2344_s8 + $0x8] sm:$0xff] }
 0x1cf   :  { %v556_v39 = vmax.f32 %v489_v35, %v554_v37  ;;  %v744_v35 = vstv %s2150_s1 }
 0x1d0   :  { %834 = vmatpush.msra.mxu0 %v1967_v0  ;;  %v1223_v0 = vld [vmem:[%s2343_s7 + $0xe8] sm:$0xff] }
 0x1d1   :  { %v2025_v40 = vadd.f32 %v558_v38, %v556_v39 }
 0x1d2   :  { %835 = vmatpush.msra.mxu0 %v1978_v3  ;;  %v1222_v3 = vld [vmem:[%s2343_s7 + $0xe0] sm:$0xff] }
 0x1d3   :  { %v560_v41 = vmax.f32 %v2025_v40, 0.0 }
 0x1d4   :  { %836 = vmatpush.msra.mxu0 %v1987_v8  ;;  %v1220_v8 = vld [vmem:[%s2343_s7 + $0xd0] sm:$0xff] }
 0x1d5   :  { %1179 = vmatmul.msk.f32.vlgmr.msrb.gmra.mxu3 %vm129_vm0, %v560_v41 }
 0x1d6   :  { %791 = vmatpush.msrb.mxu3 %v1197_v44  ;;  %v585_v44 = vld [vmem:[%s2344_s8] sm:$0xff]  ;;  %837 = vmatpush.msra.mxu0 %v1996_v10  ;;  %v1219_v10 = vld [vmem:[%s2343_s7 + $0xc8] sm:$0xff] }
 0x1d8   :  { %792 = vmatpush.msrb.mxu3 %v1196_v51  ;;  %838 = vmatpush.msra.mxu0 %v2034_v42  ;;  %v1218_v42 = vld [vmem:[%s2343_s7 + $0xc0] sm:$0xff]  ;;  %v1210_v51 = vld [vmem:[%s2343_s7 + $0xb0] sm:$0xff] }
 0x1da   :  { %793 = vmatpush.msrb.mxu3 %v1195_v56  ;;  %839 = vmatpush.msra.mxu0 %v2041_v43  ;;  %v1211_v43 = vld [vmem:[%s2343_s7 + $0xb8] sm:$0xff]  ;;  %v103_v56 = vand.u32 127, %v102_v54 }
 0x1dc   :  { %794 = vmatpush.msrb.mxu3 %v1194_v59  ;;  %vm104_vm1 = vcmp.eq.s32.totalorder %v103_v56, 0 }
 0x1de   :  { %795 = vmatpush.msrb.mxu3 %v1193_v63 }
 0x1e0   :  { %796 = vmatpush.msrb.mxu3 %v1192_v12  ;;  %v1206_v12 = vld [vmem:[%s2343_s7 + $0x90] sm:$0xff] }
 0x1e2   :  { %797 = vmatpush.msrb.mxu3 %v1191_v17  ;;  %v964_v17 = vld [vmem:[%s2346_s10 + $0x48] sm:$0xff] }
 0x1e4   :  { %798 = vmatpush.msrb.mxu3 %v1190_v24 }
 0x258   :  { %v581_v1 = vpop.f32.mrf.mxu3 }
 0x259   :  { %v584_v13 = vmax.f32 %v560_v41, %v581_v1  ;;  %v588_v41 = vld [vmem:[%s2344_s8 + $0x18] sm:$0xff] }
 0x25b   :  { %v664_v18 = vmul.f32 %v663_v7, %v584_v13  ;;  %v740_v19 = vmul.f32 %v739_v9, %v584_v13  ;;  %v815_v20 = vmul.f32 %v814_v11, %v584_v13  ;;  %v890_v28 = vmul.f32 %v889_v16, %v584_v13  ;;  %v1209_v7 = vld [vmem:[%s2343_s7 + $0xa8] sm:$0xff]  ;;  %v1208_v9 = vld [vmem:[%s2343_s7 + $0xa0] sm:$0xff]  ;;  %v1207_v11 = vld [vmem:[%s2343_s7 + $0x98] sm:$0xff] }
 0x25c   :  { %v1205_v13 = vld [vmem:[%s2343_s7 + $0x88] sm:$0xff]  ;;  %v965_v16 = vld [vmem:[%s2346_s10 + $0x50] sm:$0xff] }
 0x25d   :  { %v665_v25 = vadd.f32 %v664_v18, %v2013_v30  ;;  %v741_v26 = vadd.f32 %v740_v19, %v2015_v31  ;;  %v816_v27 = vadd.f32 %v815_v20, %v2017_v32  ;;  %v589_v30 = vld [vmem:[%s2344_s8 + $0x20] sm:$0xff]  ;;  %v891_v31 = vadd.f32 %v890_v28, %v2019_v33  ;;  %v1224_v33 = vld [vmem:[%s2343_s7 + $0xf0] sm:$0xff]  ;;  %v962_v19 = vld [vmem:[%s2346_s10 + $0x38] sm:$0xff] }
 0x25e   :  { %624 = vmatpush.msra.mxu1 %v589_v30  ;;  %v963_v18 = vld [vmem:[%s2346_s10 + $0x40] sm:$0xff]  ;;  %v961_v20 = vld [vmem:[%s2346_s10 + $0x30] sm:$0xff]  ;;  %v999_v30 = vld [vmem:[%s2348_s12 + $0x18] sm:$0xff] }
 0x25f   :  { %v667_v37 = vadd.f32 %v666_v23, %v665_v25  ;;  %v743_v38 = vadd.f32 %v742_v4, %v741_v26  ;;  %v818_v39 = vadd.f32 %v817_v6, %v816_v27  ;;  %v893_v49 = vadd.f32 %v892_v47, %v891_v31  ;;  %v960_v23 = vld [vmem:[%s2346_s10 + $0x28] sm:$0xff]  ;;  %v959_v4 = vld [vmem:[%s2346_s10 + $0x20] sm:$0xff] }
 0x260   :  { %625 = vmatpush.msra.mxu1 %v588_v41 }
 0x261   :  { %v669_v32 = vmax.f32 %v667_v37, %v668_v34  ;;  %v745_v40 = vmax.f32 %v743_v38, %v744_v35  ;;  %v2188_v46 = vmax.f32 %v818_v39, %v819_v36  ;;  %v895_v48 = vmax.f32 %v893_v49, %v894_v50  ;;  %v958_v34 = vld [vmem:[%s2346_s10 + $0x18] sm:$0xff]  ;;  %v957_v35 = vld [vmem:[%s2346_s10 + $0x10] sm:$0xff]  ;;  %v956_v36 = vld [vmem:[%s2346_s10 + $0x8] sm:$0xff] }
 0x262   :  { %626 = vmatpush.msra.mxu1 %v587_v2  ;;  %v955_v37 = vld [vmem:[%s2346_s10] sm:$0xff]  ;;  %v1001_v38 = vld [vmem:[%s2348_s12 + $0x28] sm:$0xff]  ;;  %v998_v2 = vld [vmem:[%s2348_s12 + $0x10] sm:$0xff] }
 0x263   :  { %1183 = vmatmul.msk.f32.vlgmr.msra.gmra.mxu3 %vm129_vm0, %v669_v32  ;;  %1189 = vmatmul.msk.f32.vlgmr.msrb.gmra.mxu2 %vm129_vm0, %v745_v40  ;;  %v1000_v39 = vld [vmem:[%s2348_s12 + $0x20] sm:$0xff] }
 0x264   :  { %941 = vmatpush.msra.mxu3 %v1225_v45  ;;  %627 = vmatpush.msra.mxu1 %v586_v61  ;;  %v996_v49 = vld [vmem:[%s2348_s12] sm:$0xff] }
 0x265   :  { %v1235_v61 = vld [vmem:[%s2347_s11] ss:$0 sm:$0xff] }
 0x266   :  { %942 = vmatpush.msra.mxu3 %v1224_v33  ;;  %628 = vmatpush.msra.mxu1 %v585_v44  ;;  %v997_v33 = vld [vmem:[%s2348_s12 + $0x8] sm:$0xff]  ;;  %s1038_s12 = sshll.u32 %s2350_s14, 4  ;;  %s1039_s12 = int_to_ptr.hbm [resolvable:$true] %s1038_s12 }
 0x267   :  { %629 = vmatmul.f32.vlgmr.msra.gmra.mxu1 %v1574_v55  ;;  %v1221_v55 = vld [vmem:[%s2343_s7 + $0xd8] sm:$0xff] }
 0x268   :  { %943 = vmatpush.msra.mxu3 %v1223_v0  ;;  %866 = vmatpush.msrb.mxu1 %v1211_v43  ;;  %v1236_v0 = vld [vmem:[%s2349_s13] ss:$0 sm:$0xff] }
 0x26a   :  { %944 = vmatpush.msra.mxu3 %v1222_v3  ;;  %867 = vmatpush.msrb.mxu1 %v1210_v51 }
 0x26b   :  { %1217 = vmatmul.msk.f32.vlgmr.msra.gmra.mxu2 %vm129_vm0, %v895_v48 }
 0x26c   :  { %945 = vmatpush.msra.mxu3 %v1221_v55  ;;  %868 = vmatpush.msrb.mxu1 %v1209_v7 }
 0x26e   :  { %946 = vmatpush.msra.mxu3 %v1220_v8  ;;  %869 = vmatpush.msrb.mxu1 %v1208_v9 }
 0x270   :  { %947 = vmatpush.msra.mxu3 %v1219_v10  ;;  %870 = vmatpush.msrb.mxu1 %v1207_v11 }
 0x272   :  { %948 = vmatpush.msra.mxu3 %v1218_v42  ;;  %871 = vmatpush.msrb.mxu1 %v1206_v12 }
 0x274   :  { %872 = vmatpush.msrb.mxu1 %v1205_v13 }
 0x276   :  { %873 = vmatpush.msrb.mxu1 %v1204_v14 }
 0x278   :  { %1020 = vmatpush.msra.mxu1 %v1001_v38 }
 0x27a   :  { %1021 = vmatpush.msra.mxu1 %v1000_v39 }
 0x27c   :  { %1022 = vmatpush.msra.mxu1 %v999_v30 }
 0x27e   :  { %1023 = vmatpush.msra.mxu1 %v998_v2 }
 0x280   :  { %1024 = vmatpush.msra.mxu1 %v997_v33 }
 0x282   :  { %1025 = vmatpush.msra.mxu1 %v996_v49 }
 0x2e4   :  { %v630_v22 = vpop.f32.mrf.mxu1 }
 0x2e5   :  { %v631_v6 = vadd.f32 %v1234_v21, %v630_v22 }
 0x2e6   :  { %v690_v52 = vpop.f32.mrf.mxu3  ;;  %v766_v58 = vpop.f32.mrf.mxu2 }
 0x2e7   :  { %v693_v59 = vmax.f32 %v669_v32, %v690_v52  ;;  %v769_v57 = vmax.f32 %v745_v40, %v766_v58  ;;  %v651_v24 = vadd.f32 %v650_v53, %v631_v6 }
 0x2e9   :  { %v696_v60 = vsel %vm104_vm1, %v669_v32, %v693_v59  ;;  %v770_v63 = vsel %vm104_vm1, %v745_v40, %v769_v57 }
 0x2ea   :  { %1184 = vmatmul.msk.f32.vlgmr.msrb.gmra.mxu0 %vm129_vm0, %v696_v60  ;;  %1198 = vmatmul.msk.f32.vlgmr.msrb.gmra.mxu3 %vm129_vm0, %v770_v63 }
 0x2eb   :  { %979 = vmatpush.msrb.mxu0 %v966_v15 }
 0x2ed   :  { %980 = vmatpush.msrb.mxu0 %v965_v16 }
 0x2ee   :  { %v916_v5 = vpop.f32.mrf.mxu2 }
 0x2ef   :  { %v919_v62 = vmax.f32 %v895_v48, %v916_v5  ;;  %981 = vmatpush.msrb.mxu0 %v964_v17 }
 0x2f1   :  { %v920_v1 = vsel %vm104_vm1, %v895_v48, %v919_v62  ;;  %982 = vmatpush.msrb.mxu0 %v963_v18 }
 0x2f2   :  { %1203 = vmatmul.msk.f32.vlgmr.msra.gmra.mxu0 %vm129_vm0, %v2188_v46  ;;  %1226 = vmatmul.msk.f32.vlgmr.msra.gmra.mxu3 %vm129_vm0, %v920_v1 }
 0x2f3   :  { %983 = vmatpush.msrb.mxu0 %v962_v19 }
 0x2f5   :  { %984 = vmatpush.msrb.mxu0 %v961_v20 }
 0x2f7   :  { %985 = vmatpush.msrb.mxu0 %v960_v23 }
 0x2f9   :  { %986 = vmatpush.msrb.mxu0 %v959_v4 }
 0x2fb   :  { %987 = vmatpush.msrb.mxu0 %v958_v34 }
 0x2fd   :  { %988 = vmatpush.msrb.mxu0 %v957_v35 }
 0x2ff   :  { %989 = vmatpush.msrb.mxu0 %v956_v36 }
 0x301   :  { %990 = vmatpush.msrb.mxu0 %v955_v37 }
 0x367   :  { %v725_v25 = vpop.f32.mrf.mxu0 }
 0x368   :  { %v728_v26 = vadd.f32 %v725_v25, %v651_v24 }
 0x36d   :  { %v800_v31 = vpop.f32.mrf.mxu3 }
 0x36e   :  { %v803_v32 = vadd.f32 %v800_v31, %v728_v26 }
 0x36f   :  { %v841_v27 = vpop.f32.mrf.mxu0 }
 0x370   :  { %v844_v28 = vmax.f32 %v2188_v46, %v841_v27 }
 0x372   :  { %v845_v29 = vsel %vm104_vm1, %v2188_v46, %v844_v28 }
 0x373   :  { %1212 = vmatmul.msk.f32.vlgmr.msrb.gmra.mxu1 %vm129_vm0, %v845_v29 }
 0x375   :  { %v950_v45 = vpop.f32.mrf.mxu3 }
 0x3f0   :  { %v875_v40 = vpop.f32.mrf.mxu1 }
 0x3f1   :  { %v878_v41 = vadd.f32 %v875_v40, %v803_v32 }
 0x3f3   :  { %v953_v46 = vadd.f32 %v950_v45, %v878_v41 }
 0x3f5   :  { %v954_v47 = vmax.f32 %v953_v46, 0.0 }
 0x3f7   :  { %1227 = vmatmul.msk.f32.vlgmr.msrb.gmra.mxu0 %vm971_vm2, %v954_v47 }
 0x474   :  { %v992_v50 = vpop.f32.mrf.mxu0 }
 0x475   :  { %v993_v44 = vadd.f32 %v1235_v61, %v992_v50 }
 0x477   :  { %v995_v48 = vmax.f32 %v993_v44, 0.0 }
 0x479   :  { %1228 = vmatmul.msk.f32.vlgmr.msra.gmra.mxu1 %vm1006_vm3, %v995_v48 }
 0x4f6   :  { %v1027_v3 = vpop.f32.mrf.mxu1 }
 0x4f7   :  { %v1028_v55 = vadd.f32 %v1236_v0, %v1027_v3 }
 0x4f9   :  { %1030 = vst [vmem:[#allocation8] sm:$0xff] %v1028_v55 }
 0x4fa   :  { %1041 = dma.vmem_to_hbm [thread:$0]  %s1037_s28, 128, %s1039_s12, [#allocation3]  }
 0x4fb   :  { %1301 = dma.done.wait [#allocation3], 128  }
 0x4fc   :  { %1302 = vsyncadd [#allocation3], 4294967168 }
 0x4fd   :  { %1046 = vsyncpa [#allocation3], 1 }
 0x4fe   :  { %1047 = vsyncpa [#allocation4], 1 }
 0x4ff   :  { %1048 = vsyncpa [#allocation6], 1 }

</bundles_post_ra>
